<compile_context>
chip_gen: v7x
topology: tpu7x:2x2x1
jax: 0.10.0
libtpu: 0.0.40
codegen_flags: <defaults>
</compile_context>

<pallas_src>
import jax
import jax.numpy as jnp
from jax.experimental import pallas as pl
from jax.experimental.pallas import tpu as pltpu

HIDDEN = 256      # MLP hidden_dim
EPS = 1e-5        # BatchNorm1d default eps


# --------------------------------------------------------------------------
# Shared branch math: 3 x (Linear[BN-folded] + ReLU).  bf16 operands,
# f32 MXU accumulation, bf16 hidden outputs.  Dropout = identity (eval).
# --------------------------------------------------------------------------
def _branch_compute(x, c, w1x, w1c, b1, w2, b2, w3, b3):
    h1 = (jnp.dot(x, w1x, preferred_element_type=jnp.float32)
          + jnp.dot(c, w1c, preferred_element_type=jnp.float32)
          + b1)
    h1 = jnp.maximum(h1, 0.0).astype(jnp.bfloat16)

    h2 = jnp.dot(h1, w2, preferred_element_type=jnp.float32) + b2
    h2 = jnp.maximum(h2, 0.0).astype(jnp.bfloat16)

    h3 = jnp.dot(h2, w3, preferred_element_type=jnp.float32) + b3
    h3 = jnp.maximum(h3, 0.0).astype(jnp.bfloat16)
    return h1, h2, h3


# --------------------------------------------------------------------------
# Kernel A: one grid step == one branch (0 = inv, 1 = spec).  Used on
# multi-TensorCore chips so the branches shard across cores.
# --------------------------------------------------------------------------
def _branch_grid_kernel(x_ref, c_ref,
                        w1x_ref, w1c_ref, b1_ref,
                        w2_ref, b2_ref,
                        w3_ref, b3_ref,
                        h1_ref, h2_ref, h3_ref):
    h1, h2, h3 = _branch_compute(
        x_ref[...], c_ref[...],
        w1x_ref[...], w1c_ref[...], b1_ref[...],
        w2_ref[...], b2_ref[...],
        w3_ref[...], b3_ref[...])
    h1_ref[...] = h1
    h2_ref[...] = h2
    h3_ref[...] = h3


# --------------------------------------------------------------------------
# Kernel B: single step, both branches unrolled.  Used on single-TC chips
# (v5e/v6e): no second grid-step overhead, all weight DMAs issued up front.
# --------------------------------------------------------------------------
def _single_step_kernel(x_ref, c_ref,
                        w1x_ref, w1c_ref, b1_ref,
                        w2_ref, b2_ref,
                        w3_ref, b3_ref,
                        h1_ref, h2_ref, h3_ref):
    x = x_ref[...]
    c = c_ref[...]
    for b in range(2):          # static unroll over (inv, spec)
        h1, h2, h3 = _branch_compute(
            x, c,
            w1x_ref[b], w1c_ref[b], b1_ref[b],
            w2_ref[b], b2_ref[b],
            w3_ref[b], b3_ref[b])
        h1_ref[b] = h1
        h2_ref[b] = h2
        h3_ref[b] = h3


# --------------------------------------------------------------------------
# pallas_call wrapper.
# --------------------------------------------------------------------------
def _cost_estimate(Bp, Dx, Dc):
    flops = 2 * 2 * Bp * ((Dx + Dc) * HIDDEN + 2 * HIDDEN * HIDDEN)
    bytes_accessed = (
        Bp * (Dx + Dc) * 2                                     # activations bf16
        + 2 * ((Dx + Dc) * HIDDEN + 2 * HIDDEN * HIDDEN) * 2   # weights bf16
        + 2 * 3 * HIDDEN * 4                                   # biases f32
        + 2 * Bp * 3 * HIDDEN * 2)                             # hidden outputs bf16
    return pl.CostEstimate(flops=flops, transcendentals=0,
                           bytes_accessed=bytes_accessed)


def _single_tensorcore_chip():
    """True for v5e / v6e style single-TensorCore chips."""
    try:
        kind = jax.devices()[0].device_kind.lower()
    except Exception:
        return False
    return any(t in kind for t in
               ("v5 lite", "v5e", "v5lite", "v6 lite", "v6e", "v6lite"))


def fused_mlp_forward(x_bf, c_bf, sp, use_branch_grid=None):
    """x_bf: [Bp, Dx] bf16, c_bf: [Bp, Dc] bf16, sp: stacked [2, ...] params.

    Returns (h1, h2, h3), each [2, Bp, HIDDEN] bfloat16.
    """
    Bp, Dx = x_bf.shape
    _, Dc = c_bf.shape
    if use_branch_grid is None:
        use_branch_grid = not _single_tensorcore_chip()

    out_shapes = tuple(jax.ShapeDtypeStruct((2, Bp, HIDDEN), jnp.bfloat16)
                       for _ in range(3))
    args = (x_bf, c_bf,
            sp["w1x"], sp["w1c"], sp["b1"],
            sp["w2"], sp["b2"],
            sp["w3"], sp["b3"])
    ce = _cost_estimate(Bp, Dx, Dc)

    if use_branch_grid:
        shared2 = lambda b: (0, 0)        # x / coord reused by both branches
        branch3 = lambda b: (b, 0, 0)     # per-branch stacked tensors
        in_specs = [
            pl.BlockSpec((Bp, Dx), shared2),
            pl.BlockSpec((Bp, Dc), shared2),
            pl.BlockSpec((None, Dx, HIDDEN), branch3),
            pl.BlockSpec((None, Dc, HIDDEN), branch3),
            pl.BlockSpec((None, 1, HIDDEN), branch3),
            pl.BlockSpec((None, HIDDEN, HIDDEN), branch3),
            pl.BlockSpec((None, 1, HIDDEN), branch3),
            pl.BlockSpec((None, HIDDEN, HIDDEN), branch3),
            pl.BlockSpec((None, 1, HIDDEN), branch3),
        ]
        out_specs = tuple(pl.BlockSpec((None, Bp, HIDDEN), branch3)
                          for _ in range(3))
        return pl.pallas_call(
            _branch_grid_kernel,
            out_shape=out_shapes,
            grid=(2,),
            in_specs=in_specs,
            out_specs=out_specs,
            compiler_params=pltpu.CompilerParams(
                dimension_semantics=("parallel",)),
            cost_estimate=ce,
        )(*args)

    # Single-TC path: no grid -> whole arrays resident in VMEM (~2.1 MB total),
    # one kernel invocation, all weight DMAs issued concurrently up front.
    return pl.pallas_call(
        _single_step_kernel,
        out_shape=out_shapes,
        cost_estimate=ce,
    )(*args)


# --------------------------------------------------------------------------
# Parameter construction / offline BN folding.
# --------------------------------------------------------------------------
def init_mlp_params(key, in_dim, out_dim):
    """Raw f32 params with shapes matching the PyTorch MLP (Linear + BN)."""
    def linear(k, din, dout):
        kw, kb = jax.random.split(k)
        bound = 1.0 / float(din) ** 0.5
        w = jax.random.uniform(kw, (din, dout), jnp.float32, -bound, bound)
        b = jax.random.uniform(kb, (1, dout), jnp.float32, -bound, bound)
        return w, b

    def bn_fold(k, dim):
        kg, kb, km, kv = jax.random.split(k, 4)
        gamma = 1.0 + 0.1 * jax.random.normal(kg, (1, dim), jnp.float32)
        beta = 0.1 * jax.random.normal(kb, (1, dim), jnp.float32)
        run_mean = 0.1 * jax.random.normal(km, (1, dim), jnp.float32)
        run_var = jnp.abs(jax.random.normal(kv, (1, dim), jnp.float32)) + 0.5
        scale = gamma / jnp.sqrt(run_var + EPS)
        shift = beta - run_mean * scale
        return scale, shift

    keys = jax.random.split(key, 7)
    p = {}
    p["w1"], p["b1"] = linear(keys[0], in_dim, HIDDEN)
    p["s1"], p["t1"] = bn_fold(keys[1], HIDDEN)
    p["w2"], p["b2"] = linear(keys[2], HIDDEN, HIDDEN)
    p["s2"], p["t2"] = bn_fold(keys[3], HIDDEN)
    p["w3"], p["b3"] = linear(keys[4], HIDDEN, HIDDEN)
    p["s3"], p["t3"] = bn_fold(keys[5], HIDDEN)
    p["wo"], p["bo"] = linear(keys[6], HIDDEN, out_dim)
    return p


def _fold_branch_f32(p):
    """Fold eval-mode BatchNorm1d into the preceding Linear (exact in f32)."""
    def fold(w, b, s, t):
        return w * s, b * s + t
    w1, b1 = fold(p["w1"], p["b1"], p["s1"], p["t1"])
    w2, b2 = fold(p["w2"], p["b2"], p["s2"], p["t2"])
    w3, b3 = fold(p["w3"], p["b3"], p["s3"], p["t3"])
    return w1, b1, w2, b2, w3, b3


def fold_and_pack(p, dx):
    """Fold BN, split w1 into x/coord parts, cast weights to bf16.

    The tiny output head (wo/bo) stays f32 and is applied OUTSIDE the kernel.
    """
    w1, b1, w2, b2, w3, b3 = _fold_branch_f32(p)
    return {
        "w1x": w1[:dx].astype(jnp.bfloat16),
        "w1c": w1[dx:].astype(jnp.bfloat16),
        "b1": b1,
        "w2": w2.astype(jnp.bfloat16), "b2": b2,
        "w3": w3.astype(jnp.bfloat16), "b3": b3,
        "wo": p["wo"], "bo": p["bo"],
    }


def pack_module_params(p_inv_raw, p_spec_raw, dx):
    ki = fold_and_pack(p_inv_raw, dx)
    ks = fold_and_pack(p_spec_raw, dx)
    stacked = {k: jnp.stack([ki[k], ks[k]], axis=0)
               for k in ("w1x", "w1c", "b1", "w2", "b2", "w3", "b3")}
    stacked["wo_inv"], stacked["bo_inv"] = ki["wo"], ki["bo"]
    stacked["wo_spec"], stacked["bo_spec"] = ks["wo"], ks["bo"]
    return stacked


# --------------------------------------------------------------------------
# Full module forward.
# --------------------------------------------------------------------------
def mlp_disentangle_pos_fixed(x, coord, params, num_classes=8, num_domains=2):
    """Forward of MLPDisentanglePosFixed (eval mode).  x, coord: NCHW float32."""
    assert params["wo_inv"].shape[1] == num_classes
    assert params["wo_spec"].shape[1] == num_domains

    pos_enc = coord
    B = x.shape[0]
    x_flat = x.reshape(B, -1).astype(jnp.bfloat16)
    c_flat = coord.reshape(B, -1).astype(jnp.bfloat16)

    # Pad batch to a multiple of 16 (bf16 packs 16 sublanes per vreg).
    Bp = max(16, -(-B // 16) * 16)
    if Bp != B:
        x_flat = jnp.pad(x_flat, ((0, Bp - B), (0, 0)))
        c_flat = jnp.pad(c_flat, ((0, Bp - B), (0, 0)))

    h1, h2, h3 = fused_mlp_forward(x_flat, c_flat, params)

    # Tiny 8-/2-wide heads as plain XLA matmuls on the returned h3 features.
    inv_fc_feat = h3[0, :B].astype(jnp.float32)
    spec_fc_feat = h3[1, :B].astype(jnp.float32)
    classif = (jnp.dot(inv_fc_feat, params["wo_inv"],
                       preferred_element_type=jnp.float32) + params["bo_inv"])
    classif_spec = (jnp.dot(spec_fc_feat, params["wo_spec"],
                            preferred_element_type=jnp.float32) + params["bo_spec"])

    inv_emb = h1[0, :B].astype(jnp.float32)
    spec_emb = h1[1, :B].astype(jnp.float32)
    inv_emb_n1 = h2[0, :B].astype(jnp.float32)
    spec_emb_n1 = h2[1, :B].astype(jnp.float32)

    return (classif, inv_emb, spec_emb, classif_spec,
            inv_emb_n1, spec_emb_n1, inv_fc_feat, spec_fc_feat, pos_enc)


# --------------------------------------------------------------------------
# References for correctness checks.
# --------------------------------------------------------------------------
def reference_branch_bf16(x, coord, packed, branch):
    """Plain-JAX branch using the identical bf16 folded params (tight check)."""
    B = x.shape[0]
    xf = x.reshape(B, -1).astype(jnp.bfloat16)
    cf = coord.reshape(B, -1).astype(jnp.bfloat16)
    h1, h2, h3 = _branch_compute(
        xf, cf,
        packed["w1x"][branch], packed["w1c"][branch], packed["b1"][branch],
        packed["w2"][branch], packed["b2"][branch],
        packed["w3"][branch], packed["b3"][branch])
    wo = packed["wo_inv"] if branch == 0 else packed["wo_spec"]
    bo = packed["bo_inv"] if branch == 0 else packed["bo_spec"]
    out = (jnp.dot(h3.astype(jnp.float32), wo,
                   preferred_element_type=jnp.float32) + bo)
    return (out, h1.astype(jnp.float32), h2.astype(jnp.float32),
            h3.astype(jnp.float32))


def reference_branch_f32(x, coord, raw):
    """Pure-f32 reference of the PyTorch eval-mode math (loose check)."""
    B = x.shape[0]
    xc = jnp.concatenate((x.reshape(B, -1), coord.reshape(B, -1)), axis=1)
    w1, b1, w2, b2, w3, b3 = _fold_branch_f32(raw)
    h1 = jnp.maximum(xc @ w1 + b1, 0.0)
    h2 = jnp.maximum(h1 @ w2 + b2, 0.0)
    h3 = jnp.maximum(h2 @ w3 + b3, 0.0)
    out = h3 @ raw["wo"] + raw["bo"]
    return out, h1, h2, h3


def _max_abs(a):
    return float(jnp.max(jnp.abs(a)))


if __name__ == "__main__":
    key = jax.random.PRNGKey(0)
    kx, kc, kinv, kspec = jax.random.split(key, 4)

    B, C, H, W = 2, 4, 16, 16        # image-like input, NCHW
    C_POS = 2                        # positional-encoding channels (coord)
    NUM_CLASSES, NUM_DOMAINS = 8, 2

    x = jax.random.normal(kx, (B, C, H, W), jnp.float32)
    coord = jax.random.normal(kc, (B, C_POS, H, W), jnp.float32)

    in_dim = (C + C_POS) * H * W     # 1536 after concat + flatten
    dx = C * H * W                   # x portion of the flattened row

    inv_raw = init_mlp_params(kinv, in_dim, NUM_CLASSES)
    spec_raw = init_mlp_params(kspec, in_dim, NUM_DOMAINS)
    packed = pack_module_params(inv_raw, spec_raw, dx)

    outs = jax.block_until_ready(
        mlp_disentangle_pos_fixed(x, coord, packed, NUM_CLASSES, NUM_DOMAINS))

    expected_shapes = [
        (B, NUM_CLASSES), (B, HIDDEN), (B, HIDDEN), (B, NUM_DOMAINS),
        (B, HIDDEN), (B, HIDDEN), (B, HIDDEN), (B, HIDDEN),
        (B, C_POS, H, W),
    ]
    assert len(outs) == 9
    for o, s in zip(outs, expected_shapes):
        assert o.shape == s, (o.shape, s)

    (classif, inv_emb, spec_emb, classif_spec,
     inv_emb_n1, spec_emb_n1, inv_fc_feat, spec_fc_feat, pos_enc) = outs

    # ---- tight check vs bf16-matched reference (same folded bf16 params) ----
    ref_inv = reference_branch_bf16(x, coord, packed, 0)
    ref_spec = reference_branch_bf16(x, coord, packed, 1)
    tight = [
        (classif, ref_inv[0]), (inv_emb, ref_inv[1]),
        (inv_emb_n1, ref_inv[2]), (inv_fc_feat, ref_inv[3]),
        (classif_spec, ref_spec[0]), (spec_emb, ref_spec[1]),
        (spec_emb_n1, ref_spec[2]), (spec_fc_feat, ref_spec[3]),
    ]
    for got, ref in tight:
        err = _max_abs(got - ref)
        assert err < 5e-2, err

    # ---- loose check vs full-f32 reference (true PyTorch eval-mode math) ----
    f32_inv = reference_branch_f32(x, coord, inv_raw)
    f32_spec = reference_branch_f32(x, coord, spec_raw)
    loose = [
        (classif, f32_inv[0]), (inv_emb, f32_inv[1]),
        (inv_emb_n1, f32_inv[2]), (inv_fc_feat, f32_inv[3]),
        (classif_spec, f32_spec[0]), (spec_emb, f32_spec[1]),
        (spec_emb_n1, f32_spec[2]), (spec_fc_feat, f32_spec[3]),
    ]
    for got, ref in loose:
        rel = _max_abs(got - ref) / max(_max_abs(ref), 1e-3)
        assert rel < 5e-2, rel

    assert jnp.array_equal(pos_enc, coord)

    print("KERNEL_OK")
</pallas_src>

<mosaic_0001>
module attributes {stable_mosaic.version = 11 : i64} {
  func.func @_branch_grid_kernel(%arg0: i32, %arg1: memref<16x1024xbf16, #tpu.memory_space<vmem>>, %arg2: memref<16x512xbf16, #tpu.memory_space<vmem>>, %arg3: memref<1x1024x256xbf16, #tpu.memory_space<vmem>>, %arg4: memref<1x512x256xbf16, #tpu.memory_space<vmem>>, %arg5: memref<1x1x256xf32, #tpu.memory_space<vmem>>, %arg6: memref<1x256x256xbf16, #tpu.memory_space<vmem>>, %arg7: memref<1x1x256xf32, #tpu.memory_space<vmem>>, %arg8: memref<1x256x256xbf16, #tpu.memory_space<vmem>>, %arg9: memref<1x1x256xf32, #tpu.memory_space<vmem>>, %arg10: memref<1x16x256xbf16, #tpu.memory_space<vmem>>, %arg11: memref<1x16x256xbf16, #tpu.memory_space<vmem>>, %arg12: memref<1x16x256xbf16, #tpu.memory_space<vmem>>) attributes {dimension_semantics = [#tpu.dimension_semantics<parallel>], iteration_bounds = array<i64: 2>, scalar_prefetch = 0 : i64, scratch_operands = 0 : i64, tpu.core_type = #tpu.core_type<tc>, window_params = [{pipeline_mode = #tpu.pipeline_mode<synchronous>, transform_indices = @transform_0, window_bounds = array<i64: 16, 1024>}, {pipeline_mode = #tpu.pipeline_mode<synchronous>, transform_indices = @transform_1, window_bounds = array<i64: 16, 512>}, {transform_indices = @transform_2, window_bounds = array<i64: 1, 1024, 256>}, {transform_indices = @transform_3, window_bounds = array<i64: 1, 512, 256>}, {transform_indices = @transform_4, window_bounds = array<i64: 1, 1, 256>}, {transform_indices = @transform_5, window_bounds = array<i64: 1, 256, 256>}, {transform_indices = @transform_6, window_bounds = array<i64: 1, 1, 256>}, {transform_indices = @transform_7, window_bounds = array<i64: 1, 256, 256>}, {transform_indices = @transform_8, window_bounds = array<i64: 1, 1, 256>}, {transform_indices = @transform_9, window_bounds = array<i64: 1, 16, 256>}, {transform_indices = @transform_10, window_bounds = array<i64: 1, 16, 256>}, {transform_indices = @transform_11, window_bounds = array<i64: 1, 16, 256>}]} {
    %c0 = arith.constant 0 : index
    %c0_0 = arith.constant 0 : index
    %0 = vector.load %arg1[%c0, %c0_0] : memref<16x1024xbf16, #tpu.memory_space<vmem>>, vector<16x1024xbf16>
    %c0_1 = arith.constant 0 : index
    %c0_2 = arith.constant 0 : index
    %1 = vector.load %arg2[%c0_1, %c0_2] : memref<16x512xbf16, #tpu.memory_space<vmem>>, vector<16x512xbf16>
    %c0_3 = arith.constant 0 : index
    %c0_4 = arith.constant 0 : index
    %c0_5 = arith.constant 0 : index
    %2 = vector.load %arg3[%c0_3, %c0_4, %c0_5] : memref<1x1024x256xbf16, #tpu.memory_space<vmem>>, vector<1x1024x256xbf16>
    %3 = vector.shape_cast %2 : vector<1x1024x256xbf16> to vector<1024x256xbf16>
    %c0_6 = arith.constant 0 : index
    %c0_7 = arith.constant 0 : index
    %c0_8 = arith.constant 0 : index
    %4 = vector.load %arg4[%c0_6, %c0_7, %c0_8] : memref<1x512x256xbf16, #tpu.memory_space<vmem>>, vector<1x512x256xbf16>
    %5 = vector.shape_cast %4 : vector<1x512x256xbf16> to vector<512x256xbf16>
    %c0_9 = arith.constant 0 : index
    %c0_10 = arith.constant 0 : index
    %c0_11 = arith.constant 0 : index
    %6 = vector.load %arg5[%c0_9, %c0_10, %c0_11] : memref<1x1x256xf32, #tpu.memory_space<vmem>>, vector<1x1x256xf32>
    %7 = vector.shape_cast %6 : vector<1x1x256xf32> to vector<1x256xf32>
    %c0_12 = arith.constant 0 : index
    %c0_13 = arith.constant 0 : index
    %c0_14 = arith.constant 0 : index
    %8 = vector.load %arg6[%c0_12, %c0_13, %c0_14] : memref<1x256x256xbf16, #tpu.memory_space<vmem>>, vector<1x256x256xbf16>
    %9 = vector.shape_cast %8 : vector<1x256x256xbf16> to vector<256x256xbf16>
    %c0_15 = arith.constant 0 : index
    %c0_16 = arith.constant 0 : index
    %c0_17 = arith.constant 0 : index
    %10 = vector.load %arg7[%c0_15, %c0_16, %c0_17] : memref<1x1x256xf32, #tpu.memory_space<vmem>>, vector<1x1x256xf32>
    %11 = vector.shape_cast %10 : vector<1x1x256xf32> to vector<1x256xf32>
    %c0_18 = arith.constant 0 : index
    %c0_19 = arith.constant 0 : index
    %c0_20 = arith.constant 0 : index
    %12 = vector.load %arg8[%c0_18, %c0_19, %c0_20] : memref<1x256x256xbf16, #tpu.memory_space<vmem>>, vector<1x256x256xbf16>
    %13 = vector.shape_cast %12 : vector<1x256x256xbf16> to vector<256x256xbf16>
    %c0_21 = arith.constant 0 : index
    %c0_22 = arith.constant 0 : index
    %c0_23 = arith.constant 0 : index
    %14 = vector.load %arg9[%c0_21, %c0_22, %c0_23] : memref<1x1x256xf32, #tpu.memory_space<vmem>>, vector<1x1x256xf32>
    %15 = vector.shape_cast %14 : vector<1x1x256xf32> to vector<1x256xf32>
    %cst = arith.constant dense<0.000000e+00> : vector<16x256xf32>
    %16 = tpu.matmul %0, %3, %cst {dimension_numbers = #tpu.dot_dimension_numbers<[1], [0], [0], [1], [0, 0, 1, 1], [], []>} : vector<16x1024xbf16>, vector<1024x256xbf16>, vector<16x256xf32> -> vector<16x256xf32>
    %cst_24 = arith.constant dense<0.000000e+00> : vector<16x256xf32>
    %17 = tpu.matmul %1, %5, %cst_24 {dimension_numbers = #tpu.dot_dimension_numbers<[1], [0], [0], [1], [0, 0, 1, 1], [], []>} : vector<16x512xbf16>, vector<512x256xbf16>, vector<16x256xf32> -> vector<16x256xf32>
    %18 = arith.addf %16, %17 : vector<16x256xf32>
    %19 = vector.broadcast %7 : vector<1x256xf32> to vector<16x256xf32>
    %20 = arith.addf %18, %19 : vector<16x256xf32>
    %cst_25 = arith.constant 0.000000e+00 : f32
    %21 = vector.broadcast %cst_25 : f32 to vector<16x256xf32>
    %22 = arith.maximumf %20, %21 : vector<16x256xf32>
    %23 = arith.truncf %22 : vector<16x256xf32> to vector<16x256xbf16>
    %cst_26 = arith.constant dense<0.000000e+00> : vector<16x256xf32>
    %24 = tpu.matmul %23, %9, %cst_26 {dimension_numbers = #tpu.dot_dimension_numbers<[1], [0], [0], [1], [0, 0, 1, 1], [], []>} : vector<16x256xbf16>, vector<256x256xbf16>, vector<16x256xf32> -> vector<16x256xf32>
    %25 = vector.broadcast %11 : vector<1x256xf32> to vector<16x256xf32>
    %26 = arith.addf %24, %25 : vector<16x256xf32>
    %cst_27 = arith.constant 0.000000e+00 : f32
    %27 = vector.broadcast %cst_27 : f32 to vector<16x256xf32>
    %28 = arith.maximumf %26, %27 : vector<16x256xf32>
    %29 = arith.truncf %28 : vector<16x256xf32> to vector<16x256xbf16>
    %cst_28 = arith.constant dense<0.000000e+00> : vector<16x256xf32>
    %30 = tpu.matmul %29, %13, %cst_28 {dimension_numbers = #tpu.dot_dimension_numbers<[1], [0], [0], [1], [0, 0, 1, 1], [], []>} : vector<16x256xbf16>, vector<256x256xbf16>, vector<16x256xf32> -> vector<16x256xf32>
    %31 = vector.broadcast %15 : vector<1x256xf32> to vector<16x256xf32>
    %32 = arith.addf %30, %31 : vector<16x256xf32>
    %cst_29 = arith.constant 0.000000e+00 : f32
    %33 = vector.broadcast %cst_29 : f32 to vector<16x256xf32>
    %34 = arith.maximumf %32, %33 : vector<16x256xf32>
    %35 = arith.truncf %34 : vector<16x256xf32> to vector<16x256xbf16>
    %c0_30 = arith.constant 0 : index
    %c0_31 = arith.constant 0 : index
    %c0_32 = arith.constant 0 : index
    %36 = vector.load %arg10[%c0_30, %c0_31, %c0_32] : memref<1x16x256xbf16, #tpu.memory_space<vmem>>, vector<1x16x256xbf16>
    %37 = vector.shape_cast %36 : vector<1x16x256xbf16> to vector<16x256xbf16>
    %38 = vector.shape_cast %23 : vector<16x256xbf16> to vector<1x16x256xbf16>
    tpu.vector_store %arg10[%c0_30, %c0_31, %c0_32], %38 {strides = array<i32>} : memref<1x16x256xbf16, #tpu.memory_space<vmem>>, vector<1x16x256xbf16>,
    %c0_33 = arith.constant 0 : index
    %c0_34 = arith.constant 0 : index
    %c0_35 = arith.constant 0 : index
    %39 = vector.load %arg11[%c0_33, %c0_34, %c0_35] : memref<1x16x256xbf16, #tpu.memory_space<vmem>>, vector<1x16x256xbf16>
    %40 = vector.shape_cast %39 : vector<1x16x256xbf16> to vector<16x256xbf16>
    %41 = vector.shape_cast %29 : vector<16x256xbf16> to vector<1x16x256xbf16>
    tpu.vector_store %arg11[%c0_33, %c0_34, %c0_35], %41 {strides = array<i32>} : memref<1x16x256xbf16, #tpu.memory_space<vmem>>, vector<1x16x256xbf16>,
    %c0_36 = arith.constant 0 : index
    %c0_37 = arith.constant 0 : index
    %c0_38 = arith.constant 0 : index
    %42 = vector.load %arg12[%c0_36, %c0_37, %c0_38] : memref<1x16x256xbf16, #tpu.memory_space<vmem>>, vector<1x16x256xbf16>
    %43 = vector.shape_cast %42 : vector<1x16x256xbf16> to vector<16x256xbf16>
    %44 = vector.shape_cast %35 : vector<16x256xbf16> to vector<1x16x256xbf16>
    tpu.vector_store %arg12[%c0_36, %c0_37, %c0_38], %44 {strides = array<i32>} : memref<1x16x256xbf16, #tpu.memory_space<vmem>>, vector<1x16x256xbf16>,
    return
  }
  func.func @transform_0(%arg0: i32) -> (i32, i32) {
    %c0_i32 = arith.constant 0 : i32
    %c0_i32_0 = arith.constant 0 : i32
    %c0_i32_1 = arith.constant 0 : i32
    return %c0_i32, %c0_i32_0 : i32, i32
  }
  func.func @transform_1(%arg0: i32) -> (i32, i32) {
    %c0_i32 = arith.constant 0 : i32
    %c0_i32_0 = arith.constant 0 : i32
    %c0_i32_1 = arith.constant 0 : i32
    return %c0_i32, %c0_i32_0 : i32, i32
  }
  func.func @transform_2(%arg0: i32) -> (i32, i32, i32) {
    %c0_i32 = arith.constant 0 : i32
    %c0_i32_0 = arith.constant 0 : i32
    %c0_i32_1 = arith.constant 0 : i32
    return %arg0, %c0_i32, %c0_i32_0 : i32, i32, i32
  }
  func.func @transform_3(%arg0: i32) -> (i32, i32, i32) {
    %c0_i32 = arith.constant 0 : i32
    %c0_i32_0 = arith.constant 0 : i32
    %c0_i32_1 = arith.constant 0 : i32
    return %arg0, %c0_i32, %c0_i32_0 : i32, i32, i32
  }
  func.func @transform_4(%arg0: i32) -> (i32, i32, i32) {
    %c0_i32 = arith.constant 0 : i32
    %c0_i32_0 = arith.constant 0 : i32
    %c0_i32_1 = arith.constant 0 : i32
    return %arg0, %c0_i32, %c0_i32_0 : i32, i32, i32
  }
  func.func @transform_5(%arg0: i32) -> (i32, i32, i32) {
    %c0_i32 = arith.constant 0 : i32
    %c0_i32_0 = arith.constant 0 : i32
    %c0_i32_1 = arith.constant 0 : i32
    return %arg0, %c0_i32, %c0_i32_0 : i32, i32, i32
  }
  func.func @transform_6(%arg0: i32) -> (i32, i32, i32) {
    %c0_i32 = arith.constant 0 : i32
    %c0_i32_0 = arith.constant 0 : i32
    %c0_i32_1 = arith.constant 0 : i32
    return %arg0, %c0_i32, %c0_i32_0 : i32, i32, i32
  }
  func.func @transform_7(%arg0: i32) -> (i32, i32, i32) {
    %c0_i32 = arith.constant 0 : i32
    %c0_i32_0 = arith.constant 0 : i32
    %c0_i32_1 = arith.constant 0 : i32
    return %arg0, %c0_i32, %c0_i32_0 : i32, i32, i32
  }
  func.func @transform_8(%arg0: i32) -> (i32, i32, i32) {
    %c0_i32 = arith.constant 0 : i32
    %c0_i32_0 = arith.constant 0 : i32
    %c0_i32_1 = arith.constant 0 : i32
    return %arg0, %c0_i32, %c0_i32_0 : i32, i32, i32
  }
  func.func @transform_9(%arg0: i32) -> (i32, i32, i32) {
    %c0_i32 = arith.constant 0 : i32
    %c0_i32_0 = arith.constant 0 : i32
    %c0_i32_1 = arith.constant 0 : i32
    return %arg0, %c0_i32, %c0_i32_0 : i32, i32, i32
  }
  func.func @transform_10(%arg0: i32) -> (i32, i32, i32) {
    %c0_i32 = arith.constant 0 : i32
    %c0_i32_0 = arith.constant 0 : i32
    %c0_i32_1 = arith.constant 0 : i32
    return %arg0, %c0_i32, %c0_i32_0 : i32, i32, i32
  }
  func.func @transform_11(%arg0: i32) -> (i32, i32, i32) {
    %c0_i32 = arith.constant 0 : i32
    %c0_i32_0 = arith.constant 0 : i32
    %c0_i32_1 = arith.constant 0 : i32
    return %arg0, %c0_i32, %c0_i32_0 : i32, i32, i32
  }
}

</mosaic_0001>

<bundles_post_ra>
// kernel: tpu_custom_call.1
= control target key start
LH: loop header
LB: loop body
LE: loop exit
PB: predicated region body
PF: predicated region fallthrough
CT: control target
= control target key end

     0   :  { %s4962_s0 = inlined_call_operand.hbm [shape: bf16[16,1024], index: 0, kind: input, shape index: {}]   ;;  %s4963_s1 = inlined_call_operand.hbm [shape: bf16[16,512], index: 1, kind: input, shape index: {}]   ;;  %s4964_s2 = inlined_call_operand.hbm [shape: bf16[2,1024,256], index: 2, kind: input, shape index: {}]   ;;  %s4965_s3 = inlined_call_operand.hbm [shape: bf16[2,512,256], index: 3, kind: input, shape index: {}]   ;;  %s4966_s4 = inlined_call_operand.vmem [shape: f32[2,1,256], index: 4, kind: input, shape index: {}]   ;;  %s4967_s5 = inlined_call_operand.hbm [shape: bf16[2,256,256], index: 5, kind: input, shape index: {}]   ;;  %s4968_s6 = inlined_call_operand.vmem [shape: f32[2,1,256], index: 6, kind: input, shape index: {}]   ;;  %s4969_s7 = inlined_call_operand.hbm [shape: bf16[2,256,256], index: 7, kind: input, shape index: {}]   ;;  %s4970_s8 = inlined_call_operand.vmem [shape: f32[2,1,256], index: 8, kind: input, shape index: {}]   ;;  %s4971_s9 = inlined_call_operand.hbm [shape: bf16[2,16,256], index: 9, kind: output, shape index: {0}]   ;;  %s4972_s10 = inlined_call_operand.hbm [shape: bf16[2,16,256], index: 10, kind: output, shape index: {1}]   ;;  %s4973_s11 = inlined_call_operand.hbm [shape: bf16[2,16,256], index: 11, kind: output, shape index: {2}]  }
   0x1   :  { %4995 = sst [smem:[#allocation25_spill]] %s4962_s0 }
   0x2   :  { %4996 = sst [smem:[#allocation26_spill]] %s4964_s2 }
   0x3   :  { %4997 = sst [smem:[#allocation27_spill]] %s4970_s8 }
   0x4   :  { %4998 = sst [smem:[#allocation28_spill]] %s4971_s9 }
   0x5   :  { %4999 = sst [smem:[#allocation29_spill]] %s4973_s11 }
   0x6   :  { %17 = vsyncpa [#allocation3], 0 }
   0x7   :  { %18 = vsyncpa [#allocation6], 0 }
   0x8   :  { %19 = vsyncpa [#allocation4], 0 }
   0x9   :  { %21 = vsyncpa [#allocation4 + $0x1], 0 }
   0xa   :  { %22 = vsyncpa [#allocation13], 0 }
   0xb   :  { %24 = vsyncpa [#allocation13 + $0x1], 0  ;;  %s4190_s17 = smov 0   ;;  %s4192_s18 = smov 0  }
   0xc   :  { %s4194_s19 = smov 0   ;;  %s4196_s20 = smov 0  }
   0xd LB: > { %5000 = sst [smem:[#allocation20_spill]] %s4099_s17  ;;  %s4211_s21 = sadd.s32 4294967295, %s4111_s20   ;;  %s4111_s20 = sphi %s4196_s20, %s5042_s20   ;;  %s4107_s19 = sphi %s4194_s19, %s5044_s19   ;;  %s4103_s18 = sphi %s4192_s18, %s5046_s18   ;;  %s4099_s17 = sphi %s4190_s17, %s5045_s17  }
   0xe   : > { %5001 = sst [smem:[#allocation21_spill]] %s4107_s19  ;;  %s4974_s22 = sadd.s32 4294967294, %s4111_s20  }
   0xf   : > { %s4215_s23 = sadd.s32 1, %s4111_s20   ;;  %s79_s24 = sadd.s32 1, %s4107_s19 }
  0x10   : > { %5002 = sst [smem:[#allocation22_spill]] %s4215_s23  ;;  %s76_s25 = ssub.s32 %s4111_s20, %s4215_s23 }
  0x11   : > { %p86_p0 = scmp.ne.s32.totalorder %s4107_s19, %s4103_s18  ;;  %p77_p1 = scmp.eq.s32.totalorder %s76_s25, 0 }
  0x12   : > { %p87_p2 = scmp.eq.s32.totalorder %s4111_s20, 0  ;;  %p92_p3 = scmp.ne.s32.totalorder %s4103_s18, %s4099_s17 }
  0x13   : > { %p4978_p4 = scmp.eq.s32.totalorder %s4211_s21, 0  ;;  %p272_p7 = scmp.eq.s32.totalorder %s4211_s21, 1 }
  0x14   : > { %s4227_s26 = scalar_select %p77_p1, %s4107_s19, %s79_s24  }
  0x15   : > { %p4229_p5 = por %p87_p2, %p86_p0  ;;  %p4235_p6 = por %p4978_p4, %p92_p3 }
  0x16   : > { %5003 = sst [smem:[#allocation23_spill]] %s4227_s26  ;;  %p278_p8 = scmp.eq.s32.totalorder %s4974_s22, 1 }
  0x17   : > { %s5004_s27 = scalar_select %p4229_p5, 1, 0 }
  0x18   : > { %s5005_s28 = scalar_select %p4235_p6, 1, 0 }
  0x19   : > { %p2964_p9 = scmp.ge.s32.totalorder %s4111_s20, 1  ;;  %p337_p10 = scmp.lt.s32.totalorder %s4111_s20, 3 }
  0x1a   : > { %p4244_p11 = por %p272_p7, %p86_p0  ;;  %p4248_p12 = por %p278_p8, %p92_p3 }
  0x1b   : > { %p4252_p13 = pnand %p2964_p9, %p337_p10  ;;  %s4113_s13 = smov [#allocation2]  }
  0x1c   : > { %s5006_s29 = scalar_select %p4244_p11, 1, 0 }
  0x1d   : > { %s5007_s30 = scalar_select %p4248_p12, 1, 0 }
  0x1e   : > { %s5009_s12 = scalar_select %p4252_p13, 1, 0 }
  0x1f   : > { %5008 = sst [smem:[#allocation24_spill]] %s5007_s30  ;;  %p3333_p1 = pneg %p4252_p13 }
  0x20   : > { %s349_s14 = sshll.u32 %s4113_s13, 4  ;;  %s5011_s0 = sld [smem:[#allocation25_spill]]  ;;  %s350_s14 = int_to_ptr.vmem [resolvable:$true] %s349_s14 }
  0x21   : > { %p4260_p2 = pnand %p3333_p1, %p4978_p4 }
  0x23   : > { %s5010_s15 = scalar_select %p4260_p2, 1, 0 }
  0x24   : > { %p4984_p8 = pneg %p4260_p2 }
  0x26   : > { %s3801_s22 = scalar_lea.hbm %s5011_s0, 1024 }
  0x27   : > { %p3802_p7 = scmp.ne.s32.totalorder %s5011_s0, %s3801_s22  ;;  %p3808_p1 = scmp.lt.u32.totalorder %s3801_s22, %s5011_s0 }
  0x29   : > { %p3804_p9 = pnand %p4984_p8, %p3802_p7 }
  0x2b   : > { %p3805_p10 = pneg %p3804_p9 }
  0x2d   : > { %p3810_p0 = pnand %p3808_p1, %p3805_p10 }
  0x2f   : > { %3813 = shalt.err (!%p3810_p0)
}
  0x30   : > { %s3814_s16 = scalar_lea.vmem %s350_s14, 1024  ;;  %p3822_p11 = scmp.lt.s32.totalorder %s350_s14, %s350_s14 }
  0x31   : > { %p3815_p4 = scmp.ne.s32.totalorder %s350_s14, %s3814_s16  ;;  %p3823_p6 = scmp.lt.s32.totalorder %s3814_s16, %s3814_s16 }
  0x33   : > { %p3817_p3 = pnand %p3815_p4, %p4984_p8  ;;  %p3824_p13 = por %p3823_p6, %p3822_p11 }
  0x35   : > { %p3818_p12 = pneg %p3817_p3 }
  0x37   : > { %p3825_p5 = pnand %p3824_p13, %p3818_p12 }
  0x39   : > { %3828 = shalt.err (!%p3825_p5)
}
  0x3a   : > { %s4114_s23 = smov 512   ;;  %s4115_s22 = smov 32  }
  0x3b   : > { %3336 = dma.hbm_to_vmem [thread:$0]  (!%p4260_p2), %s5011_s0, 1024, %s350_s14, [#allocation3], %s4114_s23, %s4114_s23, %s4115_s22  }
  0x3c   : > { %p5012_p4 = scmp.ne.s32.totalorder %s5004_s27, 0  ;;  %p5013_p0 = scmp.lt.s32.totalorder %s4111_s20, 2 }
  0x3d   : > { %s4298_s24 = sand.u32 1, %s4107_s19   ;;  %s3278_s13 = sshll.u32 %s4111_s20, 14 }
  0x3e   : > { %p4293_p3 = pnand %p5013_p0, %p5012_p4  ;;  %s2968_s25 = sshll.u32 %s4298_s24, 10 }
  0x3f   : > { %s5015_s2 = sld [smem:[#allocation26_spill]]  ;;  %s380_s27 = scalar_lea.vmem [#allocation7], %s2968_s25 }
  0x40   : > { %s5014_s16 = scalar_select %p4293_p3, 1, 0 }
  0x41   : > { %s387_s14 = sshll.u32 %s380_s27, 4  ;;  %s2971_s23 = sshll.u32 %s4298_s24, 9  ;;  %s4307_s14 = int_to_ptr.vmem [resolvable:$true] %s387_s14 }
  0x42   : > { %s5016_s22 = sand.u32 1, %s4111_s20   ;;  %p4318_p6 = pneg %p4293_p3 }
  0x43   : > { %s4312_s26 = scalar_lea.sflag [#allocation3], %s5016_s22 }
  0x44   : > { %s5017_s0 = scalar_select %p4318_p6, 1, 0 }
  0x45   : > { %s4305_s8 = scalar_lea.hbm %s5015_s2, %s3278_s13  ;;  %s3834_s25 = scalar_lea.hbm %s5015_s2, 32768 }
  0x46   : > { %s3829_s30 = scalar_lea.hbm %s4305_s8, 16384  ;;  %p3835_p13 = scmp.lt.u32.totalorder %s4305_s8, %s5015_s2 }
  0x47   : > { %p3830_p5 = scmp.ne.s32.totalorder %s4305_s8, %s3829_s30  ;;  %p3836_p7 = scmp.lt.u32.totalorder %s3834_s25, %s3829_s30 }
  0x48   : > { %p3838_p10 = scmp.lt.u32.totalorder %s3829_s30, %s4305_s8 }
  0x49   : > { %p3832_p11 = pnand %p4318_p6, %p3830_p5  ;;  %p3837_p9 = por %p3836_p7, %p3835_p13 }
  0x4b   : > { %p3833_p12 = pneg %p3832_p11  ;;  %p3839_p1 = por %p3838_p10, %p3837_p9 }
  0x4d   : > { %p3840_p4 = pnand %p3839_p1, %p3833_p12 }
  0x4f   : > { %3843 = shalt.err (!%p3840_p4)
}
  0x50   : > { %s3844_s22 = scalar_lea.vmem %s4307_s14, 16384  ;;  %s4116_s11 = smov [#allocation7]  }
  0x51   : > { %p3845_p0 = scmp.ne.s32.totalorder %s4307_s14, %s3844_s22  ;;  %s3849_s17 = sshll.u32 %s4116_s11, 4  ;;  %s3850_s17 = int_to_ptr.vmem [resolvable:$false] %s3849_s17 }
  0x52   : > { %s3851_s13 = scalar_lea.vmem %s3850_s17, 32768  ;;  %p3852_p8 = scmp.lt.s32.totalorder %s4307_s14, %s3850_s17 }
  0x53   : > { %p3847_p5 = pnand %p3845_p0, %p4318_p6  ;;  %p3853_p2 = scmp.lt.s32.totalorder %s3851_s13, %s3844_s22 }
  0x55   : > { %p3848_p11 = pneg %p3847_p5  ;;  %p3854_p13 = por %p3853_p2, %p3852_p8 }
  0x57   : > { %p3855_p7 = pnand %p3854_p13, %p3848_p11 }
  0x59   : > { %3858 = shalt.err (!%p3855_p7)
}
  0x5a   : > { %s4994_s30 = smov 128   ;;  %s4118_s25 = smov 8  }
  0x5b   : > { %3343 = dma.hbm_to_vmem [thread:$0]  (!%p4293_p3), %s4305_s8, 16384, %s4307_s14, %s4312_s26, %s4994_s30, %s4994_s30, %s4118_s25  }
  0x5c   : > { %s3279_s27 = sshll.u32 %s4111_s20, 13  ;;  %s401_s13 = scalar_lea.vmem [#allocation8], %s2971_s23 }
  0x5d   : > { %s4349_s17 = scalar_lea.hbm %s4965_s3, %s3279_s27  ;;  %s408_s2 = sshll.u32 %s401_s13, 4  ;;  %s4353_s2 = int_to_ptr.vmem [resolvable:$true] %s408_s2 }
  0x5e   : > { %s4989_s19 = sshll.u32 %s4298_s24, 8  ;;  %s3859_s9 = scalar_lea.hbm %s4349_s17, 8192 }
  0x5f   : > { %p3860_p2 = scmp.ne.s32.totalorder %s4349_s17, %s3859_s9  ;;  %s3864_s27 = scalar_lea.hbm %s4965_s3, 16384 }
  0x60   : > { %p3865_p9 = scmp.lt.u32.totalorder %s4349_s17, %s4965_s3  ;;  %p3866_p10 = scmp.lt.u32.totalorder %s3864_s27, %s3859_s9 }
  0x61   : > { %p3862_p8 = pnand %p3860_p2, %p4318_p6  ;;  %p3868_p4 = scmp.lt.u32.totalorder %s3859_s9, %s4349_s17 }
  0x62   : > { %p3867_p1 = por %p3866_p10, %p3865_p9 }
  0x63   : > { %p3863_p12 = pneg %p3862_p8 }
  0x64   : > { %p3869_p0 = por %p3868_p4, %p3867_p1 }
  0x66   : > { %p3870_p5 = pnand %p3869_p0, %p3863_p12 }
  0x68   : > { %3873 = shalt.err (!%p3870_p5)
}
  0x69   : > { %s3874_s23 = scalar_lea.vmem %s4353_s2, 8192  ;;  %s4119_s13 = smov [#allocation8]  }
  0x6a   : > { %p3875_p11 = scmp.ne.s32.totalorder %s4353_s2, %s3874_s23  ;;  %s3879_s8 = sshll.u32 %s4119_s13, 4  ;;  %s3880_s8 = int_to_ptr.vmem [resolvable:$false] %s3879_s8 }
  0x6b   : > { %s3881_s14 = scalar_lea.vmem %s3880_s8, 16384  ;;  %p3882_p2 = scmp.lt.s32.totalorder %s4353_s2, %s3880_s8 }
  0x6c   : > { %p3877_p13 = pnand %p3875_p11, %p4318_p6  ;;  %p3883_p8 = scmp.lt.s32.totalorder %s3881_s14, %s3874_s23 }
  0x6e   : > { %p3878_p7 = pneg %p3877_p13  ;;  %p3884_p9 = por %p3883_p8, %p3882_p2 }
  0x70   : > { %p3885_p10 = pnand %p3884_p9, %p3878_p7 }
  0x72   : > { %3888 = shalt.err (!%p3885_p10)
}
  0x73   : > { %3346 = dma.hbm_to_vmem [thread:$0]  (!%p4293_p3), %s4349_s17, 8192, %s4353_s2, %s4312_s26, %s4994_s30, %s4994_s30, %s4118_s25  }
  0x74   : > { %s4990_s9 = sshll.u32 %s4111_s20, 12  ;;  %s429_s23 = scalar_lea.vmem [#allocation9], %s4989_s19 }
  0x75   : > { %s4387_s11 = scalar_lea.hbm %s4967_s5, %s4990_s9  ;;  %s436_s13 = sshll.u32 %s429_s23, 4  ;;  %s4391_s13 = int_to_ptr.vmem [resolvable:$true] %s436_s13 }
  0x76   : > { %s3889_s8 = scalar_lea.hbm %s4387_s11, 4096  ;;  %s3894_s14 = scalar_lea.hbm %s4967_s5, 8192 }
  0x77   : > { %p3890_p12 = scmp.ne.s32.totalorder %s4387_s11, %s3889_s8  ;;  %p3895_p0 = scmp.lt.u32.totalorder %s4387_s11, %s4967_s5 }
  0x78   : > { %p3896_p5 = scmp.lt.u32.totalorder %s3894_s14, %s3889_s8  ;;  %p3898_p13 = scmp.lt.u32.totalorder %s3889_s8, %s4387_s11 }
  0x79   : > { %p3892_p1 = pnand %p3890_p12, %p4318_p6 }
  0x7a   : > { %p3897_p11 = por %p3896_p5, %p3895_p0 }
  0x7b   : > { %p3893_p4 = pneg %p3892_p1 }
  0x7c   : > { %p3899_p7 = por %p3898_p13, %p3897_p11 }
  0x7e   : > { %p3900_p2 = pnand %p3899_p7, %p3893_p4 }
  0x80   : > { %3903 = shalt.err (!%p3900_p2)
}
  0x81   : > { %s3904_s23 = scalar_lea.vmem %s4391_s13, 4096  ;;  %s4120_s2 = smov [#allocation9]  }
  0x82   : > { %p3905_p8 = scmp.ne.s32.totalorder %s4391_s13, %s3904_s23  ;;  %s3909_s17 = sshll.u32 %s4120_s2, 4  ;;  %s3910_s17 = int_to_ptr.vmem [resolvable:$false] %s3909_s17 }
  0x83   : > { %s3911_s27 = scalar_lea.vmem %s3910_s17, 8192  ;;  %p3912_p12 = scmp.lt.s32.totalorder %s4391_s13, %s3910_s17 }
  0x84   : > { %p3907_p9 = pnand %p3905_p8, %p4318_p6  ;;  %p3913_p1 = scmp.lt.s32.totalorder %s3911_s27, %s3904_s23 }
  0x86   : > { %p3908_p10 = pneg %p3907_p9  ;;  %p3914_p0 = por %p3913_p1, %p3912_p12 }
  0x88   : > { %p3915_p5 = pnand %p3914_p0, %p3908_p10 }
  0x8a   : > { %3918 = shalt.err (!%p3915_p5)
}
  0x8b   : > { %3349 = dma.hbm_to_vmem [thread:$0]  (!%p4293_p3), %s4387_s11, 4096, %s4391_s13, %s4312_s26, %s4994_s30, %s4994_s30, %s4118_s25  }
  0x8c   : > { %s4121_s8 = smov [#allocation5]   ;;  %s3919_s23 = scalar_lea.hbm %s4963_s1, 512 }
  0x8d   : > { %s362_s14 = sshll.u32 %s4121_s8, 4  ;;  %p3920_p4 = scmp.ne.s32.totalorder %s4963_s1, %s3919_s23  ;;  %s363_s14 = int_to_ptr.vmem [resolvable:$true] %s362_s14 }
  0x8e   : > { %p5018_p11 = scmp.ne.s32.totalorder %s5010_s15, 0  ;;  %p3926_p8 = scmp.lt.u32.totalorder %s3919_s23, %s4963_s1 }
  0x90   : > { %p5019_p13 = pneg %p5018_p11 }
  0x92   : > { %p3922_p7 = pnand %p3920_p4, %p5019_p13 }
  0x94   : > { %p3923_p2 = pneg %p3922_p7 }
  0x96   : > { %p3928_p9 = pnand %p3926_p8, %p3923_p2 }
  0x98   : > { %3931 = shalt.err (!%p3928_p9)
}
  0x99   : > { %s3932_s11 = scalar_lea.vmem %s363_s14, 512  ;;  %p5020_p12 = pmov %p5019_p13 }
  0x9a   : > { %p3933_p10 = scmp.ne.s32.totalorder %s363_s14, %s3932_s11  ;;  %p3940_p5 = scmp.lt.s32.totalorder %s363_s14, %s363_s14 }
  0x9b   : > { %p3941_p3 = scmp.lt.s32.totalorder %s3932_s11, %s3932_s11 }
  0x9c   : > { %p3935_p1 = pnand %p3933_p10, %p5020_p12 }
  0x9d   : > { %p3942_p6 = por %p3941_p3, %p3940_p5 }
  0x9e   : > { %p3936_p0 = pneg %p3935_p1 }
  0xa0   : > { %p3943_p4 = pnand %p3942_p6, %p3936_p0 }
  0xa2   : > { %3946 = shalt.err (!%p3943_p4)
}
  0xa3   : > { %s4122_s13 = smov 256   ;;  %s4123_s19 = smov 16  }
  0xa4   : > { %3339 = dma.hbm_to_vmem [thread:$0]  (!%p5018_p11), %s4963_s1, 512, %s363_s14, [#allocation6], %s4122_s13, %s4122_s13, %s4123_s19  }
  0xa5   : > { %s5021_s22 = sshll.u32 %s4111_s20, 12  ;;  %s5022_s27 = sshll.u32 %s4298_s24, 8 }
  0xa6   : > { %s4443_s17 = scalar_lea.hbm %s4969_s7, %s5021_s22  ;;  %s457_s11 = scalar_lea.vmem [#allocation10], %s5022_s27 }
  0xa7   : > { %s464_s30 = sshll.u32 %s457_s11, 4  ;;  %s3947_s15 = scalar_lea.hbm %s4443_s17, 4096  ;;  %s4447_s30 = int_to_ptr.vmem [resolvable:$true] %s464_s30 }
  0xa8   : > { %p3948_p3 = scmp.ne.s32.totalorder %s4443_s17, %s3947_s15  ;;  %p5023_p6 = scmp.ne.s32.totalorder %s5017_s0, 0 }
  0xa9   : > { %s3952_s19 = scalar_lea.hbm %s4969_s7, 8192  ;;  %p3953_p7 = scmp.lt.u32.totalorder %s4443_s17, %s4969_s7 }
  0xaa   : > { %p3950_p13 = pnand %p3948_p3, %p5023_p6  ;;  %p3954_p2 = scmp.lt.u32.totalorder %s3952_s19, %s3947_s15 }
  0xab   : > { %p3956_p9 = scmp.lt.u32.totalorder %s3947_s15, %s4443_s17 }
  0xac   : > { %p3951_p11 = pneg %p3950_p13  ;;  %p3955_p8 = por %p3954_p2, %p3953_p7 }
  0xae   : > { %p3957_p10 = por %p3956_p9, %p3955_p8 }
  0xb0   : > { %p3958_p12 = pnand %p3957_p10, %p3951_p11 }
  0xb2   : > { %3961 = shalt.err (!%p3958_p12)
}
  0xb3   : > { %s3962_s24 = scalar_lea.vmem %s4447_s30, 4096  ;;  %s4124_s22 = smov [#allocation10]  }
  0xb4   : > { %p3963_p1 = scmp.ne.s32.totalorder %s4447_s30, %s3962_s24  ;;  %s3967_s2 = sshll.u32 %s4124_s22, 4  ;;  %s3968_s2 = int_to_ptr.vmem [resolvable:$false] %s3967_s2 }
  0xb5   : > { %s3969_s23 = scalar_lea.vmem %s3968_s2, 8192  ;;  %p3970_p4 = scmp.lt.s32.totalorder %s4447_s30, %s3968_s2 }
  0xb6   : > { %p3965_p0 = pnand %p3963_p1, %p5023_p6  ;;  %p3971_p3 = scmp.lt.s32.totalorder %s3969_s23, %s3962_s24 }
  0xb8   : > { %p3966_p5 = pneg %p3965_p0  ;;  %p3972_p13 = por %p3971_p3, %p3970_p4 }
  0xba   : > { %p3973_p7 = pnand %p3972_p13, %p3966_p5 }
  0xbc   : > { %3976 = shalt.err (!%p3973_p7)
}
  0xbd   : > { %p5024_p11 = scmp.ne.s32.totalorder %s5014_s16, 0  ;;  %s5025_s27 = smov 128  }
  0xbe   : > { %p5026_p6 = scmp.ne.s32.totalorder %s5009_s12, 0 }
  0xbf   : > { %3352 = dma.hbm_to_vmem [thread:$0]  (!%p5024_p11), %s4443_s17, 4096, %s4447_s30, %s4312_s26, %s5025_s27, %s5025_s27, %s4118_s25  }
  0xc0   : > { %483 = sbr.rel (%p5026_p6) target bundleno = 1146 (0x47a), region = 56  ;;  %p5027_p2 = scmp.eq.s32.totalorder (!%p5026_p6), %s4211_s21, 0 }
  0xc7   : > { %4078 = dma.done.wait (%p5027_p2), [#allocation3], 1024   ;;  %p5028_p8 = pmov %p5027_p2 }
  0xc8   : > { %p5029_p9 = pmov %p5027_p2 }
  0xc9   : > { %4080 = vsyncadd (%p5028_p8), [#allocation3], 4294966272 }
  0xca   : > { %4082 = dma.done.wait (%p5029_p9), [#allocation6], 512   ;;  %p5030_p10 = pmov %p5027_p2 }
  0xcb   : > { %s493_s0 = sand.u32 1, %s4211_s21   ;;  %s4486_s16 = sand.u32 1, %s4103_s18  }
  0xcc   : > { %4084 = vsyncadd (%p5030_p10), [#allocation6], 4294966784  ;;  %s2983_s12 = sshll.u32 %s4486_s16, 10  ;;  %s494_s26 = scalar_lea.sflag [#allocation3], %s493_s0 }
  0xcd   : > { %s4491_s30 = scalar_lea.vmem [#allocation7], %s2983_s12  ;;  %p5031_p12 = scmp.ne.s32.totalorder %s5005_s28, 0 }
  0xcf   : > { %4086 = dma.done.wait (%p5031_p12), %s494_s26, 32768  }
  0xd0   : > { %4088 = vsyncadd (%p5031_p12), %s494_s26, 4294934528  ;;  %v3411_v0 = vld [vmem:[%s4491_s30 + $0x4] ss:$8 sps:$4 sm:$0xff]   ;;  %v3413_v1 = vld [vmem:[%s4491_s30] ss:$8 sps:$4 sm:$0xff]   ;;  %s2984_s28 = sshll.u32 %s4486_s16, 9 }
  0xd1   : > { %1989 = vmatprep.subr.bf16.mxu0 %v3411_v0  ;;  %v3414_v2 = vld [vmem:[%s4491_s30 + $0x14] ss:$8 sps:$4 sm:$0xff]   ;;  %v3416_v3 = vld [vmem:[%s4491_s30 + $0x10] ss:$8 sps:$4 sm:$0xff]   ;;  %v3417_v4 = vld [vmem:[%s4491_s30 + $0x24] ss:$8 sps:$4 sm:$0xff]  }
  0xd2   : > { %1990 = vmatpush1.bf16.msra.mxu0 %v3413_v1  ;;  %v3419_v5 = vld [vmem:[%s4491_s30 + $0x20] ss:$8 sps:$4 sm:$0xff]   ;;  %v3420_v6 = vld [vmem:[%s4491_s30 + $0x34] ss:$8 sps:$4 sm:$0xff]   ;;  %v3422_v7 = vld [vmem:[%s4491_s30 + $0x30] ss:$8 sps:$4 sm:$0xff]  }
  0xd3   : > { %1991 = vmatprep.subr.bf16.mxu0 %v3414_v2  ;;  %v3423_v8 = vld [vmem:[%s4491_s30 + $0x44] ss:$8 sps:$4 sm:$0xff]   ;;  %v3425_v9 = vld [vmem:[%s4491_s30 + $0x40] ss:$8 sps:$4 sm:$0xff]   ;;  %v3426_v10 = vld [vmem:[%s4491_s30 + $0x54] ss:$8 sps:$4 sm:$0xff]  }
  0xd4   : > { %v3428_v11 = vld [vmem:[%s4491_s30 + $0x50] ss:$8 sps:$4 sm:$0xff]   ;;  %v3429_v12 = vld [vmem:[%s4491_s30 + $0x64] ss:$8 sps:$4 sm:$0xff]   ;;  %v3431_v13 = vld [vmem:[%s4491_s30 + $0x60] ss:$8 sps:$4 sm:$0xff]  }
  0xd5   : > { %s4512_s25 = scalar_lea.vmem [#allocation8], %s2984_s28  ;;  %v4516_v16 = vld [vmem:[#allocation2] sm:$0xff]  ;;  %v3432_v18 = vld [vmem:[%s4491_s30 + $0x74] ss:$8 sps:$4 sm:$0xff]   ;;  %v3434_v22 = vld [vmem:[%s4491_s30 + $0x70] ss:$8 sps:$4 sm:$0xff]  }
  0xd6   : > { %1992 = vmatpush1.bf16.msra.mxu0 %v3416_v3  ;;  %v3459_v14 = vld [vmem:[%s4512_s25 + $0x4] ss:$8 sps:$4 sm:$0xff]   ;;  %v3461_v15 = vld [vmem:[%s4512_s25] ss:$8 sps:$4 sm:$0xff]   ;;  %v3465_v20 = vld [vmem:[%s4512_s25 + $0x14] ss:$8 sps:$4 sm:$0xff]  }
  0xd7   : > { %1993 = vmatprep.subr.bf16.mxu0 %v3417_v4  ;;  %v4518_v17 = vld [vmem:[#allocation2 + $0x20] sm:$0xff]  ;;  %1223 = vmatprep.subr.bf16.mxu1 %v3459_v14  ;;  %v3467_v21 = vld [vmem:[%s4512_s25 + $0x10] ss:$8 sps:$4 sm:$0xff]   ;;  %v3477_v26 = vld [vmem:[%s4512_s25 + $0x34] ss:$8 sps:$4 sm:$0xff]   ;;  %s2985_s17 = sshll.u32 %s4486_s16, 8 }
  0xd8   : > { %v3062_v19 = vcombine.high %v4516_v16, %v4518_v17  ;;  %1224 = vmatpush1.bf16.msra.mxu1 %v3461_v15  ;;  %v3435_v23 = vld [vmem:[%s4491_s30 + $0x84] ss:$8 sps:$4 sm:$0xff]   ;;  %v3473_v25 = vld [vmem:[%s4512_s25 + $0x20] ss:$8 sps:$4 sm:$0xff]   ;;  %v3438_v28 = vld [vmem:[%s4491_s30 + $0x94] ss:$8 sps:$4 sm:$0xff]   ;;  %v3061_v58 = vcombine.low %v4516_v16, %v4518_v17 }
  0xd9   : > { %1225 = vmatprep.subr.bf16.mxu1 %v3465_v20  ;;  %v3471_v24 = vld [vmem:[%s4512_s25 + $0x24] ss:$8 sps:$4 sm:$0xff]   ;;  %v3437_v27 = vld [vmem:[%s4491_s30 + $0x80] ss:$8 sps:$4 sm:$0xff]   ;;  %v3479_v29 = vld [vmem:[%s4512_s25 + $0x30] ss:$8 sps:$4 sm:$0xff]  }
  0xda   : > { %1994 = vmatpush1.bf16.msra.mxu0 %v3419_v5  ;;  %2021 = vmatprep.mubr.bf16.mxu0 %v3062_v19  ;;  %v3483_v30 = vld [vmem:[%s4512_s25 + $0x44] ss:$8 sps:$4 sm:$0xff]   ;;  %v3440_v31 = vld [vmem:[%s4491_s30 + $0x90] ss:$8 sps:$4 sm:$0xff]   ;;  %v3485_v33 = vld [vmem:[%s4512_s25 + $0x40] ss:$8 sps:$4 sm:$0xff]  }
  0xdb   : > { %1995 = vmatprep.subr.bf16.mxu0 %v3420_v6  ;;  %v3441_v32 = vld [vmem:[%s4491_s30 + $0xa4] ss:$8 sps:$4 sm:$0xff]   ;;  %v3489_v34 = vld [vmem:[%s4512_s25 + $0x54] ss:$8 sps:$4 sm:$0xff]   ;;  %v3443_v35 = vld [vmem:[%s4491_s30 + $0xa0] ss:$8 sps:$4 sm:$0xff]  }
  0xdc   : > { %1226 = vmatpush1.bf16.msra.mxu1 %v3467_v21  ;;  %v3444_v36 = vld [vmem:[%s4491_s30 + $0xb4] ss:$8 sps:$4 sm:$0xff]   ;;  %v3491_v37 = vld [vmem:[%s4512_s25 + $0x50] ss:$8 sps:$4 sm:$0xff]   ;;  %v3495_v38 = vld [vmem:[%s4512_s25 + $0x64] ss:$8 sps:$4 sm:$0xff]  }
  0xdd   : > { %1227 = vmatprep.subr.bf16.mxu1 %v3471_v24  ;;  %v3446_v39 = vld [vmem:[%s4491_s30 + $0xb0] ss:$8 sps:$4 sm:$0xff]   ;;  %v3447_v40 = vld [vmem:[%s4491_s30 + $0xc4] ss:$8 sps:$4 sm:$0xff]   ;;  %v3497_v41 = vld [vmem:[%s4512_s25 + $0x60] ss:$8 sps:$4 sm:$0xff]  }
  0xde   : > { %1996 = vmatpush1.bf16.msra.mxu0 %v3422_v7  ;;  %v3501_v42 = vld [vmem:[%s4512_s25 + $0x74] ss:$8 sps:$4 sm:$0xff]   ;;  %v3449_v43 = vld [vmem:[%s4491_s30 + $0xc0] ss:$8 sps:$4 sm:$0xff]   ;;  %v3503_v45 = vld [vmem:[%s4512_s25 + $0x70] ss:$8 sps:$4 sm:$0xff]  }
  0xdf   : > { %1997 = vmatprep.subr.bf16.mxu0 %v3423_v8  ;;  %v3450_v44 = vld [vmem:[%s4491_s30 + $0xd4] ss:$8 sps:$4 sm:$0xff]   ;;  %v3507_v46 = vld [vmem:[%s4512_s25 + $0x84] ss:$8 sps:$4 sm:$0xff]   ;;  %v3452_v47 = vld [vmem:[%s4491_s30 + $0xd0] ss:$8 sps:$4 sm:$0xff]  }
  0xe0   : > { %1228 = vmatpush1.bf16.msra.mxu1 %v3473_v25  ;;  %v3453_v48 = vld [vmem:[%s4491_s30 + $0xe4] ss:$8 sps:$4 sm:$0xff]   ;;  %v3509_v49 = vld [vmem:[%s4512_s25 + $0x80] ss:$8 sps:$4 sm:$0xff]   ;;  %v3513_v50 = vld [vmem:[%s4512_s25 + $0x94] ss:$8 sps:$4 sm:$0xff]  }
  0xe1   : > { %1229 = vmatprep.subr.bf16.mxu1 %v3477_v26  ;;  %v3455_v51 = vld [vmem:[%s4491_s30 + $0xe0] ss:$8 sps:$4 sm:$0xff]   ;;  %v3456_v52 = vld [vmem:[%s4491_s30 + $0xf4] ss:$8 sps:$4 sm:$0xff]   ;;  %v3515_v53 = vld [vmem:[%s4512_s25 + $0x90] ss:$8 sps:$4 sm:$0xff]  }
  0xe2   : > { %1998 = vmatpush1.bf16.msra.mxu0 %v3425_v9  ;;  %v3519_v54 = vld [vmem:[%s4512_s25 + $0xa4] ss:$8 sps:$4 sm:$0xff]   ;;  %v3458_v55 = vld [vmem:[%s4491_s30 + $0xf0] ss:$8 sps:$4 sm:$0xff]   ;;  %v3521_v57 = vld [vmem:[%s4512_s25 + $0xa0] ss:$8 sps:$4 sm:$0xff]  }
  0xe3   : > { %1999 = vmatprep.subr.bf16.mxu0 %v3426_v10  ;;  %v3464_v56 = vld [vmem:[%s4491_s30 + $0x104] ss:$8 sps:$4 sm:$0xff]   ;;  %v3525_v59 = vld [vmem:[%s4512_s25 + $0xb4] ss:$8 sps:$4 sm:$0xff]   ;;  %v3462_v60 = vld [vmem:[%s4491_s30 + $0x100] ss:$8 sps:$4 sm:$0xff]  }
  0xe4   : > { %1230 = vmatpush1.bf16.msra.mxu1 %v3479_v29  ;;  %v3470_v61 = vld [vmem:[%s4491_s30 + $0x114] ss:$8 sps:$4 sm:$0xff]   ;;  %v3527_v62 = vld [vmem:[%s4512_s25 + $0xb0] ss:$8 sps:$4 sm:$0xff]   ;;  %v3531_v0 = vld [vmem:[%s4512_s25 + $0xc4] ss:$8 sps:$4 sm:$0xff]  }
  0xe5   : > { %1231 = vmatprep.subr.bf16.mxu1 %v3483_v30  ;;  %v3557_v63 = vld [vmem:[#allocation5 + $0x4] ss:$16 sps:$4 sm:$0xff]   ;;  %v3468_v1 = vld [vmem:[%s4491_s30 + $0x110] ss:$8 sps:$4 sm:$0xff]   ;;  %v4569_v2 = vld [vmem:[#allocation2 + $0x8] sm:$0xff]  ;;  %s4720_s11 = scalar_lea.vmem [#allocation9], %s2985_s17 }
  0xe6   : > { %2000 = vmatpush1.bf16.msra.mxu0 %v3428_v11  ;;  %1255 = vmatprep.mubr.bf16.mxu1 %v3557_v63  ;;  %v4571_v3 = vld [vmem:[#allocation2 + $0x28] sm:$0xff]  ;;  %v3537_v7 = vld [vmem:[%s4512_s25 + $0xd4] ss:$8 sps:$4 sm:$0xff]   ;;  %v3539_v10 = vld [vmem:[%s4512_s25 + $0xd0] ss:$8 sps:$4 sm:$0xff]   ;;  %s4763_s15 = scalar_lea.vmem [#allocation10], %s2985_s17 }
  0xe7   : > { %2001 = vmatprep.subr.bf16.mxu0 %v3429_v12  ;;  %v3476_v4 = vld [vmem:[%s4491_s30 + $0x124] ss:$8 sps:$4 sm:$0xff]   ;;  %v3064_v5 = vcombine.high %v4569_v2, %v4571_v3  ;;  %v3533_v6 = vld [vmem:[%s4512_s25 + $0xc0] ss:$8 sps:$4 sm:$0xff]   ;;  %v3482_v9 = vld [vmem:[%s4491_s30 + $0x134] ss:$8 sps:$4 sm:$0xff]  }
  0xe8   : > { %1232 = vmatpush1.bf16.msra.mxu1 %v3485_v33  ;;  %v3474_v8 = vld [vmem:[%s4491_s30 + $0x120] ss:$8 sps:$4 sm:$0xff]   ;;  %v3543_v11 = vld [vmem:[%s4512_s25 + $0xe4] ss:$8 sps:$4 sm:$0xff]   ;;  %v3480_v12 = vld [vmem:[%s4491_s30 + $0x130] ss:$8 sps:$4 sm:$0xff]  }
  0xe9   : > { %1233 = vmatprep.subr.bf16.mxu1 %v3489_v34  ;;  %v3545_v14 = vld [vmem:[%s4512_s25 + $0xe0] ss:$8 sps:$4 sm:$0xff]   ;;  %v3549_v15 = vld [vmem:[%s4512_s25 + $0xf4] ss:$8 sps:$4 sm:$0xff]   ;;  %v3560_v19 = vld [vmem:[%s4512_s25 + $0x104] ss:$8 sps:$4 sm:$0xff]  }
  0xea   : > { %2002 = vmatpush1.bf16.msra.mxu0 %v3431_v13  ;;  %v3488_v13 = vld [vmem:[%s4491_s30 + $0x144] ss:$8 sps:$4 sm:$0xff]   ;;  %v3486_v16 = vld [vmem:[%s4491_s30 + $0x140] ss:$8 sps:$4 sm:$0xff]   ;;  %v3494_v17 = vld [vmem:[%s4491_s30 + $0x154] ss:$8 sps:$4 sm:$0xff]  }
  0xeb   : > { %2003 = vmatprep.subr.bf16.mxu0 %v3432_v18  ;;  %v3551_v18 = vld [vmem:[%s4512_s25 + $0xf0] ss:$8 sps:$4 sm:$0xff]   ;;  %v3500_v21 = vld [vmem:[%s4491_s30 + $0x164] ss:$8 sps:$4 sm:$0xff]   ;;  %v3566_v24 = vld [vmem:[%s4512_s25 + $0x114] ss:$8 sps:$4 sm:$0xff]  }
  0xec   : > { %1234 = vmatpush1.bf16.msra.mxu1 %v3491_v37  ;;  %v3492_v20 = vld [vmem:[%s4491_s30 + $0x150] ss:$8 sps:$4 sm:$0xff]   ;;  %v3498_v25 = vld [vmem:[%s4491_s30 + $0x160] ss:$8 sps:$4 sm:$0xff]   ;;  %v3506_v26 = vld [vmem:[%s4491_s30 + $0x174] ss:$8 sps:$4 sm:$0xff]  }
  0xed   : > { %1235 = vmatprep.subr.bf16.mxu1 %v3495_v38  ;;  %v3504_v29 = vld [vmem:[%s4491_s30 + $0x170] ss:$8 sps:$4 sm:$0xff]   ;;  %v3512_v30 = vld [vmem:[%s4491_s30 + $0x184] ss:$8 sps:$4 sm:$0xff]   ;;  %v3510_v33 = vld [vmem:[%s4491_s30 + $0x180] ss:$8 sps:$4 sm:$0xff]  }
  0xee   : > { %2004 = vmatpush1.bf16.msra.mxu0 %v3434_v22  ;;  %v3555_v22 = vld [vmem:[#allocation5] ss:$16 sps:$4 sm:$0xff]   ;;  %v3518_v34 = vld [vmem:[%s4491_s30 + $0x194] ss:$8 sps:$4 sm:$0xff]   ;;  %v3524_v38 = vld [vmem:[%s4491_s30 + $0x1a4] ss:$8 sps:$4 sm:$0xff]  }
  0xef   : > { %2005 = vmatprep.subr.bf16.mxu0 %v3435_v23  ;;  %v3558_v23 = vld [vmem:[%s4512_s25 + $0x100] ss:$8 sps:$4 sm:$0xff]   ;;  %v3516_v37 = vld [vmem:[%s4491_s30 + $0x190] ss:$8 sps:$4 sm:$0xff]   ;;  %v3563_v63 = vld [vmem:[%s4491_s30 + $0x204] ss:$8 sps:$4 sm:$0xff]  }
  0xf0   : > { %1236 = vmatpush1.bf16.msra.mxu1 %v3497_v41  ;;  %v3522_v41 = vld [vmem:[%s4491_s30 + $0x1a0] ss:$8 sps:$4 sm:$0xff]   ;;  %p600_p1 = scmp.lt.s32.totalorder %s4211_s21, 1  ;;  %s4781_s24 = sshll.u32 %s4486_s16, 4 }
  0xf1   : > { %1237 = vmatprep.subr.bf16.mxu1 %v3501_v42  ;;  %v3530_v42 = vld [vmem:[%s4491_s30 + $0x1b4] ss:$8 sps:$4 sm:$0xff]   ;;  %s4784_s22 = scalar_lea.vmem [#allocation11], %s4781_s24  ;;  %s592_s12 = scalar_lea.vmem [#allocation12], %s4781_s24 }
  0xf2   : > { %2006 = vmatpush1.bf16.msra.mxu0 %v3437_v27  ;;  %v3564_v27 = vld [vmem:[%s4512_s25 + $0x110] ss:$8 sps:$4 sm:$0xff]   ;;  %s601_s14 = scalar_select %p600_p1, %s4211_s21, 1 }
  0xf3   : > { %2007 = vmatprep.subr.bf16.mxu0 %v3438_v28  ;;  %v3572_v28 = vld [vmem:[%s4512_s25 + $0x124] ss:$8 sps:$4 sm:$0xff]   ;;  %s2682_s26 = sshll.u32 %s4784_s22, 4  ;;  %s4830_s28 = sshll.u32 %s4211_s21, 8  ;;  %s4827_s26 = int_to_ptr.vmem [resolvable:$true] %s2682_s26 }
  0xf4   : > { %1238 = vmatpush1.bf16.msra.mxu1 %v3503_v45  ;;  %v3528_v45 = vld [vmem:[%s4491_s30 + $0x1b0] ss:$8 sps:$4 sm:$0xff]   ;;  %s4768_s13 = sshll.u32 %s601_s14, 1  ;;  %p5032_p5 = scmp.ne.s32.totalorder %s5006_s29, 0 }
  0xf5   : > { %1239 = vmatprep.subr.bf16.mxu1 %v3507_v46  ;;  %v3536_v46 = vld [vmem:[%s4491_s30 + $0x1c4] ss:$8 sps:$4 sm:$0xff]   ;;  %s603_s8 = scalar_lea.vmem %s4966_s4, %s4768_s13  ;;  %s607_s27 = scalar_lea.vmem %s4968_s6, %s4768_s13 }
  0xf6   : > { %2008 = vmatpush1.bf16.msra.mxu0 %v3440_v31  ;;  %v3570_v31 = vld [vmem:[%s4512_s25 + $0x120] ss:$8 sps:$4 sm:$0xff]   ;;  %s4125_s19 = smov [#allocation12]  }
  0xf7   : > { %2009 = vmatprep.subr.bf16.mxu0 %v3441_v32  ;;  %v3578_v32 = vld [vmem:[%s4512_s25 + $0x134] ss:$8 sps:$4 sm:$0xff]   ;;  %s3981_s9 = sshll.u32 %s4125_s19, 4  ;;  %s3982_s9 = int_to_ptr.vmem [resolvable:$false] %s3981_s9 }
  0xf8   : > { %1240 = vmatpush1.bf16.msra.mxu1 %v3509_v49  ;;  %v3656_v49 = vld [vmem:[#allocation5 + $0xc] ss:$16 sps:$4 sm:$0xff]  }
  0xf9   : > { %1241 = vmatprep.subr.bf16.mxu1 %v3513_v50  ;;  %v3534_v50 = vld [vmem:[%s4491_s30 + $0x1c0] ss:$8 sps:$4 sm:$0xff]  }
  0xfa   : > { %2010 = vmatpush1.bf16.msra.mxu0 %v3443_v35  ;;  %v3576_v35 = vld [vmem:[%s4512_s25 + $0x130] ss:$8 sps:$4 sm:$0xff]  }
  0xfb   : > { %2011 = vmatprep.subr.bf16.mxu0 %v3444_v36  ;;  %v3584_v36 = vld [vmem:[%s4512_s25 + $0x144] ss:$8 sps:$4 sm:$0xff]  }
  0xfc   : > { %1242 = vmatpush1.bf16.msra.mxu1 %v3515_v53  ;;  %v3608_v53 = vld [vmem:[%s4512_s25 + $0x184] ss:$8 sps:$4 sm:$0xff]  }
  0xfd   : > { %1243 = vmatprep.subr.bf16.mxu1 %v3519_v54  ;;  %v3540_v54 = vld [vmem:[%s4491_s30 + $0x1d0] ss:$8 sps:$4 sm:$0xff]  }
  0xfe   : > { %2012 = vmatpush1.bf16.msra.mxu0 %v3446_v39  ;;  %v3582_v39 = vld [vmem:[%s4512_s25 + $0x140] ss:$8 sps:$4 sm:$0xff]  }
  0xff   : > { %2013 = vmatprep.subr.bf16.mxu0 %v3447_v40  ;;  %v3590_v40 = vld [vmem:[%s4512_s25 + $0x154] ss:$8 sps:$4 sm:$0xff]  }
 0x100   : > { %1244 = vmatpush1.bf16.msra.mxu1 %v3521_v57  ;;  %v3614_v57 = vld [vmem:[%s4512_s25 + $0x194] ss:$8 sps:$4 sm:$0xff]  }
 0x101   : > { %1245 = vmatprep.subr.bf16.mxu1 %v3525_v59  ;;  %v3554_v59 = vld [vmem:[%s4491_s30 + $0x1f4] ss:$8 sps:$4 sm:$0xff]  }
 0x102   : > { %2014 = vmatpush1.bf16.msra.mxu0 %v3449_v43  ;;  %v3588_v43 = vld [vmem:[%s4512_s25 + $0x150] ss:$8 sps:$4 sm:$0xff]  }
 0x103   : > { %2015 = vmatprep.subr.bf16.mxu0 %v3450_v44  ;;  %v3596_v44 = vld [vmem:[%s4512_s25 + $0x164] ss:$8 sps:$4 sm:$0xff]  }
 0x104   : > { %1246 = vmatpush1.bf16.msra.mxu1 %v3527_v62  ;;  %v3620_v62 = vld [vmem:[%s4512_s25 + $0x1a4] ss:$8 sps:$4 sm:$0xff]  }
 0x105   : > { %1247 = vmatprep.subr.bf16.mxu1 %v3531_v0  ;;  %v4632_v0 = vld [vmem:[#allocation2 + $0x10] sm:$0xff] }
 0x106   : > { %2016 = vmatpush1.bf16.msra.mxu0 %v3452_v47  ;;  %v3594_v47 = vld [vmem:[%s4512_s25 + $0x160] ss:$8 sps:$4 sm:$0xff]  }
 0x107   : > { %2017 = vmatprep.subr.bf16.mxu0 %v3453_v48  ;;  %v3602_v48 = vld [vmem:[%s4512_s25 + $0x174] ss:$8 sps:$4 sm:$0xff]  }
 0x108   : > { %1248 = vmatpush1.bf16.msra.mxu1 %v3533_v6  ;;  %v3626_v6 = vld [vmem:[%s4512_s25 + $0x1b4] ss:$8 sps:$4 sm:$0xff]  }
 0x109   : > { %1249 = vmatprep.subr.bf16.mxu1 %v3537_v7  ;;  %v3561_v7 = vld [vmem:[%s4491_s30 + $0x200] ss:$8 sps:$4 sm:$0xff]  }
 0x10a   : > { %2018 = vmatpush1.bf16.msra.mxu0 %v3455_v51  ;;  %v3542_v51 = vld [vmem:[%s4491_s30 + $0x1d4] ss:$8 sps:$4 sm:$0xff]  }
 0x10b   : > { %2019 = vmatprep.subr.bf16.mxu0 %v3456_v52  ;;  %v3600_v52 = vld [vmem:[%s4512_s25 + $0x170] ss:$8 sps:$4 sm:$0xff]  }
 0x10c   : > { %1250 = vmatpush1.bf16.msra.mxu1 %v3539_v10  ;;  %v3624_v10 = vld [vmem:[%s4512_s25 + $0x1b0] ss:$8 sps:$4 sm:$0xff]  }
 0x10d   : > { %1251 = vmatprep.subr.bf16.mxu1 %v3543_v11  ;;  %v3575_v11 = vld [vmem:[%s4491_s30 + $0x224] ss:$8 sps:$4 sm:$0xff]  }
 0x10e   : > { %2020 = vmatpush1.bf16.msra.mxu0 %v3458_v55  ;;  %v3548_v55 = vld [vmem:[%s4491_s30 + $0x1e4] ss:$8 sps:$4 sm:$0xff]  }
 0x10f   : > { %2032 = vmatprep.subr.bf16.mxu0 %v3464_v56  ;;  %v3606_v56 = vld [vmem:[%s4512_s25 + $0x180] ss:$8 sps:$4 sm:$0xff]  }
 0x110   : > { %1252 = vmatpush1.bf16.msra.mxu1 %v3545_v14  ;;  %v3573_v14 = vld [vmem:[%s4491_s30 + $0x220] ss:$8 sps:$4 sm:$0xff]  }
 0x111   : > { %2022 = vmatmul.mubr.bf16.vlgmr.msra.gmra.mrb[0].mxu0 %v3061_v58  ;;  %1253 = vmatprep.subr.bf16.mxu1 %v3549_v15  ;;  %v3546_v58 = vld [vmem:[%s4491_s30 + $0x1e0] ss:$8 sps:$4 sm:$0xff]   ;;  %v3581_v15 = vld [vmem:[%s4491_s30 + $0x234] ss:$8 sps:$4 sm:$0xff]  }
 0x112   : > { %2033 = vmatpush1.bf16.msra.mxu0 %v3462_v60  ;;  %2064 = vmatprep.mubr.bf16.mxu0 %v3064_v5  ;;  %v3552_v60 = vld [vmem:[%s4491_s30 + $0x1f0] ss:$8 sps:$4 sm:$0xff]   ;;  %v3063_v5 = vcombine.low %v4569_v2, %v4571_v3  ;;  %v3632_v2 = vld [vmem:[%s4512_s25 + $0x1c4] ss:$8 sps:$4 sm:$0xff]  }
 0x113   : > { %2034 = vmatprep.subr.bf16.mxu0 %v3470_v61  ;;  %v3612_v61 = vld [vmem:[%s4512_s25 + $0x190] ss:$8 sps:$4 sm:$0xff]  }
 0x114   : > { %1254 = vmatpush1.bf16.msra.mxu1 %v3551_v18  ;;  %v3567_v3 = vld [vmem:[%s4491_s30 + $0x210] ss:$8 sps:$4 sm:$0xff]  }
 0x115   : > { %1266 = vmatprep.subr.bf16.mxu1 %v3560_v19  ;;  %v3579_v18 = vld [vmem:[%s4491_s30 + $0x230] ss:$8 sps:$4 sm:$0xff]   ;;  %v3587_v19 = vld [vmem:[%s4491_s30 + $0x244] ss:$8 sps:$4 sm:$0xff]  }
 0x116   : > { %2035 = vmatpush1.bf16.msra.mxu0 %v3468_v1  ;;  %v4634_v1 = vld [vmem:[#allocation2 + $0x30] sm:$0xff] }
 0x117   : > { %2036 = vmatprep.subr.bf16.mxu0 %v3476_v4  ;;  %1256 = vmatmul.mubr.bf16.vlgmr.msra.gmra.mrb[0].mxu1 %v3555_v22  ;;  %v3618_v4 = vld [vmem:[%s4512_s25 + $0x1a0] ss:$8 sps:$4 sm:$0xff]  }
 0x118   : > { %1267 = vmatpush1.bf16.msra.mxu1 %v3558_v23  ;;  %1298 = vmatprep.mubr.bf16.mxu1 %v3656_v49  ;;  %v3585_v22 = vld [vmem:[%s4491_s30 + $0x240] ss:$8 sps:$4 sm:$0xff]   ;;  %v3593_v23 = vld [vmem:[%s4491_s30 + $0x254] ss:$8 sps:$4 sm:$0xff]  }
 0x119   : > { %1268 = vmatprep.subr.bf16.mxu1 %v3566_v24  ;;  %v3648_v24 = vld [vmem:[%s4512_s25 + $0x1f0] ss:$8 sps:$4 sm:$0xff]  }
 0x11a   : > { %2037 = vmatpush1.bf16.msra.mxu0 %v3474_v8  ;;  %v3066_v8 = vcombine.high %v4632_v0, %v4634_v1  ;;  %v4685_v49 = vld [vmem:[#allocation2 + $0x38] sm:$0xff] }
 0x11b   : > { %2038 = vmatprep.subr.bf16.mxu0 %v3482_v9  ;;  %v3569_v9 = vld [vmem:[%s4491_s30 + $0x214] ss:$8 sps:$4 sm:$0xff]  }
 0x11c   : > { %1269 = vmatpush1.bf16.msra.mxu1 %v3564_v27  ;;  %v3654_v27 = vld [vmem:[#allocation5 + $0x8] ss:$16 sps:$4 sm:$0xff]  }
 0x11d   : > { %1270 = vmatprep.subr.bf16.mxu1 %v3572_v28  ;;  %v3597_v28 = vld [vmem:[%s4491_s30 + $0x260] ss:$8 sps:$4 sm:$0xff]  }
 0x11e   : > { %2039 = vmatpush1.bf16.msra.mxu0 %v3480_v12  ;;  %v3630_v12 = vld [vmem:[%s4512_s25 + $0x1c0] ss:$8 sps:$4 sm:$0xff]  }
 0x11f   : > { %2040 = vmatprep.subr.bf16.mxu0 %v3488_v13  ;;  %v3638_v13 = vld [vmem:[%s4512_s25 + $0x1d4] ss:$8 sps:$4 sm:$0xff]  }
 0x120   : > { %1271 = vmatpush1.bf16.msra.mxu1 %v3570_v31  ;;  %v3611_v31 = vld [vmem:[%s4491_s30 + $0x284] ss:$8 sps:$4 sm:$0xff]  }
 0x121   : > { %1272 = vmatprep.subr.bf16.mxu1 %v3578_v32  ;;  %v3609_v32 = vld [vmem:[%s4491_s30 + $0x280] ss:$8 sps:$4 sm:$0xff]  }
 0x122   : > { %2041 = vmatpush1.bf16.msra.mxu0 %v3486_v16  ;;  %v3636_v16 = vld [vmem:[%s4512_s25 + $0x1d0] ss:$8 sps:$4 sm:$0xff]  }
 0x123   : > { %2042 = vmatprep.subr.bf16.mxu0 %v3494_v17  ;;  %v3644_v17 = vld [vmem:[%s4512_s25 + $0x1e4] ss:$8 sps:$4 sm:$0xff]  }
 0x124   : > { %1273 = vmatpush1.bf16.msra.mxu1 %v3576_v35  ;;  %v3623_v35 = vld [vmem:[%s4491_s30 + $0x2a4] ss:$8 sps:$4 sm:$0xff]  }
 0x125   : > { %1274 = vmatprep.subr.bf16.mxu1 %v3584_v36  ;;  %v3621_v36 = vld [vmem:[%s4491_s30 + $0x2a0] ss:$8 sps:$4 sm:$0xff]  }
 0x126   : > { %2043 = vmatpush1.bf16.msra.mxu0 %v3492_v20  ;;  %v3642_v20 = vld [vmem:[%s4512_s25 + $0x1e0] ss:$8 sps:$4 sm:$0xff]  }
 0x127   : > { %2044 = vmatprep.subr.bf16.mxu0 %v3500_v21  ;;  %v3650_v21 = vld [vmem:[%s4512_s25 + $0x1f4] ss:$8 sps:$4 sm:$0xff]  }
 0x128   : > { %1275 = vmatpush1.bf16.msra.mxu1 %v3582_v39  ;;  %v3635_v39 = vld [vmem:[%s4491_s30 + $0x2c4] ss:$8 sps:$4 sm:$0xff]  }
 0x129   : > { %1276 = vmatprep.subr.bf16.mxu1 %v3590_v40  ;;  %v3633_v40 = vld [vmem:[%s4491_s30 + $0x2c0] ss:$8 sps:$4 sm:$0xff]  }
 0x12a   : > { %2045 = vmatpush1.bf16.msra.mxu0 %v3498_v25  ;;  %v3591_v25 = vld [vmem:[%s4491_s30 + $0x250] ss:$8 sps:$4 sm:$0xff]  }
 0x12b   : > { %2046 = vmatprep.subr.bf16.mxu0 %v3506_v26  ;;  %v3599_v26 = vld [vmem:[%s4491_s30 + $0x264] ss:$8 sps:$4 sm:$0xff]  }
 0x12c   : > { %1277 = vmatpush1.bf16.msra.mxu1 %v3588_v43  ;;  %v3647_v43 = vld [vmem:[%s4491_s30 + $0x2e4] ss:$8 sps:$4 sm:$0xff]  }
 0x12d   : > { %1278 = vmatprep.subr.bf16.mxu1 %v3596_v44  ;;  %v3645_v44 = vld [vmem:[%s4491_s30 + $0x2e0] ss:$8 sps:$4 sm:$0xff]  }
 0x12e   : > { %2047 = vmatpush1.bf16.msra.mxu0 %v3504_v29  ;;  %v3605_v29 = vld [vmem:[%s4491_s30 + $0x274] ss:$8 sps:$4 sm:$0xff]  }
 0x12f   : > { %2048 = vmatprep.subr.bf16.mxu0 %v3512_v30  ;;  %v3603_v30 = vld [vmem:[%s4491_s30 + $0x270] ss:$8 sps:$4 sm:$0xff]  }
 0x130   : > { %1279 = vmatpush1.bf16.msra.mxu1 %v3594_v47  ;;  %v3659_v47 = vld [vmem:[%s4491_s30 + $0x304] ss:$8 sps:$4 sm:$0xff]  }
 0x131   : > { %1280 = vmatprep.subr.bf16.mxu1 %v3602_v48  ;;  %v4683_v48 = vld [vmem:[#allocation2 + $0x18] sm:$0xff] }
 0x132   : > { %2049 = vmatpush1.bf16.msra.mxu0 %v3510_v33  ;;  %v3617_v33 = vld [vmem:[%s4491_s30 + $0x294] ss:$8 sps:$4 sm:$0xff]  }
 0x133   : > { %2050 = vmatprep.subr.bf16.mxu0 %v3518_v34  ;;  %v3615_v34 = vld [vmem:[%s4491_s30 + $0x290] ss:$8 sps:$4 sm:$0xff]  }
 0x134   : > { %1281 = vmatpush1.bf16.msra.mxu1 %v3600_v52  ;;  %v3068_v52 = vcombine.high %v4683_v48, %v4685_v49 }
 0x135   : > { %1282 = vmatprep.subr.bf16.mxu1 %v3608_v53  ;;  %v3662_v53 = vld [vmem:[%s4491_s30 + $0x314] ss:$8 sps:$4 sm:$0xff]  }
 0x136   : > { %2051 = vmatpush1.bf16.msra.mxu0 %v3516_v37  ;;  %v3629_v37 = vld [vmem:[%s4491_s30 + $0x2b4] ss:$8 sps:$4 sm:$0xff]  }
 0x137   : > { %2052 = vmatprep.subr.bf16.mxu0 %v3524_v38  ;;  %v3627_v38 = vld [vmem:[%s4491_s30 + $0x2b0] ss:$8 sps:$4 sm:$0xff]  }
 0x138   : > { %1283 = vmatpush1.bf16.msra.mxu1 %v3606_v56  ;;  %v3663_v56 = vld [vmem:[%s4491_s30 + $0x320] ss:$8 sps:$4 sm:$0xff]  }
 0x139   : > { %1284 = vmatprep.subr.bf16.mxu1 %v3614_v57  ;;  %v3668_v57 = vld [vmem:[%s4491_s30 + $0x334] ss:$8 sps:$4 sm:$0xff]  }
 0x13a   : > { %2053 = vmatpush1.bf16.msra.mxu0 %v3522_v41  ;;  %v3641_v41 = vld [vmem:[%s4491_s30 + $0x2d4] ss:$8 sps:$4 sm:$0xff]  }
 0x13b   : > { %2054 = vmatprep.subr.bf16.mxu0 %v3530_v42  ;;  %v3639_v42 = vld [vmem:[%s4491_s30 + $0x2d0] ss:$8 sps:$4 sm:$0xff]  }
 0x13c   : > { %1285 = vmatpush1.bf16.msra.mxu1 %v3612_v61  ;;  %v3674_v61 = vld [vmem:[%s4491_s30 + $0x354] ss:$8 sps:$4 sm:$0xff]  }
 0x13d   : > { %1286 = vmatprep.subr.bf16.mxu1 %v3620_v62  ;;  %v3672_v62 = vld [vmem:[%s4491_s30 + $0x350] ss:$8 sps:$4 sm:$0xff]  }
 0x13e   : > { %2055 = vmatpush1.bf16.msra.mxu0 %v3528_v45  ;;  %v3653_v45 = vld [vmem:[%s4491_s30 + $0x2f4] ss:$8 sps:$4 sm:$0xff]  }
 0x13f   : > { %2056 = vmatprep.subr.bf16.mxu0 %v3536_v46  ;;  %v3651_v46 = vld [vmem:[%s4491_s30 + $0x2f0] ss:$8 sps:$4 sm:$0xff]  }
 0x140   : > { %1287 = vmatpush1.bf16.msra.mxu1 %v3618_v4  ;;  %v3678_v4 = vld [vmem:[%s4491_s30 + $0x370] ss:$8 sps:$4 sm:$0xff]  }
 0x141   : > { %1288 = vmatprep.subr.bf16.mxu1 %v3626_v6  ;;  %v3681_v6 = vld [vmem:[%s4491_s30 + $0x380] ss:$8 sps:$4 sm:$0xff]  }
 0x142   : > { %2057 = vmatpush1.bf16.msra.mxu0 %v3534_v50  ;;  %v3065_v50 = vcombine.low %v4632_v0, %v4634_v1  ;;  %v3675_v0 = vld [vmem:[%s4491_s30 + $0x360] ss:$8 sps:$4 sm:$0xff]   ;;  %v3680_v1 = vld [vmem:[%s4491_s30 + $0x374] ss:$8 sps:$4 sm:$0xff]  }
 0x143   : > { %2058 = vmatprep.subr.bf16.mxu0 %v3542_v51  ;;  %v3657_v51 = vld [vmem:[%s4491_s30 + $0x300] ss:$8 sps:$4 sm:$0xff]  }
 0x144   : > { %1289 = vmatpush1.bf16.msra.mxu1 %v3624_v10  ;;  %v3687_v10 = vld [vmem:[%s4491_s30 + $0x3a0] ss:$8 sps:$4 sm:$0xff]  }
 0x145   : > { %1290 = vmatprep.subr.bf16.mxu1 %v3632_v2  ;;  %v3692_v2 = vld [vmem:[%s4491_s30 + $0x3b4] ss:$8 sps:$4 sm:$0xff]  }
 0x146   : > { %2059 = vmatpush1.bf16.msra.mxu0 %v3540_v54  ;;  %v3660_v54 = vld [vmem:[%s4491_s30 + $0x310] ss:$8 sps:$4 sm:$0xff]  }
 0x147   : > { %2060 = vmatprep.subr.bf16.mxu0 %v3548_v55  ;;  %v3665_v55 = vld [vmem:[%s4491_s30 + $0x324] ss:$8 sps:$4 sm:$0xff]  }
 0x148   : > { %1291 = vmatpush1.bf16.msra.mxu1 %v3630_v12  ;;  %v3693_v12 = vld [vmem:[%s4491_s30 + $0x3c0] ss:$8 sps:$4 sm:$0xff]  }
 0x149   : > { %1292 = vmatprep.subr.bf16.mxu1 %v3638_v13  ;;  %v3698_v13 = vld [vmem:[%s4491_s30 + $0x3d4] ss:$8 sps:$4 sm:$0xff]  }
 0x14a   : > { %2061 = vmatpush1.bf16.msra.mxu0 %v3546_v58  ;;  %v3666_v58 = vld [vmem:[%s4491_s30 + $0x330] ss:$8 sps:$4 sm:$0xff]  }
 0x14b   : > { %2062 = vmatprep.subr.bf16.mxu0 %v3554_v59  ;;  %v3671_v59 = vld [vmem:[%s4491_s30 + $0x344] ss:$8 sps:$4 sm:$0xff]  }
 0x14c   : > { %1293 = vmatpush1.bf16.msra.mxu1 %v3636_v16  ;;  %v3710_v16 = vld [vmem:[%s4720_s11 + $0x14] ss:$8 sps:$4 sm:$0xff]  }
 0x14d   : > { %1294 = vmatprep.subr.bf16.mxu1 %v3644_v17  ;;  %v3696_v17 = vld [vmem:[%s4491_s30 + $0x3d0] ss:$8 sps:$4 sm:$0xff]  }
 0x14e   : > { %2063 = vmatpush1.bf16.msra.mxu0 %v3552_v60  ;;  %v3669_v60 = vld [vmem:[%s4491_s30 + $0x340] ss:$8 sps:$4 sm:$0xff]  }
 0x14f   : > { %2075 = vmatprep.subr.bf16.mxu0 %v3563_v63  ;;  %v3677_v63 = vld [vmem:[%s4491_s30 + $0x364] ss:$8 sps:$4 sm:$0xff]  }
 0x150   : > { %1295 = vmatpush1.bf16.msra.mxu1 %v3642_v20  ;;  %v3713_v20 = vld [vmem:[%s4720_s11 + $0x24] ss:$8 sps:$4 sm:$0xff]  }
 0x151   : > { %2065 = vmatmul.mubr.bf16.vlgmr.msra.gmra.mrb[0].mxu0 %v3063_v5  ;;  %1296 = vmatprep.subr.bf16.mxu1 %v3650_v21  ;;  %v3683_v5 = vld [vmem:[%s4491_s30 + $0x384] ss:$8 sps:$4 sm:$0xff]   ;;  %v3699_v21 = vld [vmem:[%s4491_s30 + $0x3e0] ss:$8 sps:$4 sm:$0xff]  }
 0x152   : > { %2076 = vmatpush1.bf16.msra.mxu0 %v3561_v7  ;;  %2107 = vmatprep.mubr.bf16.mxu0 %v3066_v8  ;;  %v3686_v7 = vld [vmem:[%s4491_s30 + $0x394] ss:$8 sps:$4 sm:$0xff]   ;;  %v3684_v8 = vld [vmem:[%s4491_s30 + $0x390] ss:$8 sps:$4 sm:$0xff]  }
 0x153   : > { %2077 = vmatprep.subr.bf16.mxu0 %v3569_v9  ;;  %v3689_v9 = vld [vmem:[%s4491_s30 + $0x3a4] ss:$8 sps:$4 sm:$0xff]  }
 0x154   : > { %1297 = vmatpush1.bf16.msra.mxu1 %v3648_v24  ;;  %v3716_v24 = vld [vmem:[%s4720_s11 + $0x34] ss:$8 sps:$4 sm:$0xff]  }
 0x156   : > { %2078 = vmatpush1.bf16.msra.mxu0 %v3567_v3  ;;  %v3690_v3 = vld [vmem:[%s4491_s30 + $0x3b0] ss:$8 sps:$4 sm:$0xff]  }
 0x157   : > { %2079 = vmatprep.subr.bf16.mxu0 %v3575_v11  ;;  %1299 = vmatmul.mubr.bf16.vlgmr.msra.gmra.mrb[0].mxu1 %v3654_v27  ;;  %v3695_v11 = vld [vmem:[%s4491_s30 + $0x3c4] ss:$8 sps:$4 sm:$0xff]  }
 0x158   : > { %v3719_v27 = vld [vmem:[%s4720_s11 + $0x44] ss:$8 sps:$4 sm:$0xff]  }
 0x15a   : > { %2080 = vmatpush1.bf16.msra.mxu0 %v3573_v14  ;;  %v3705_v14 = vld [vmem:[%s4720_s11] ss:$8 sps:$4 sm:$0xff]  }
 0x15b   : > { %2081 = vmatprep.subr.bf16.mxu0 %v3581_v15  ;;  %v3707_v15 = vld [vmem:[%s4720_s11 + $0x4] ss:$8 sps:$4 sm:$0xff]  }
 0x15c   : > { %2353 = vmatprep.subr.bf16.mxu1 %v3707_v15 }
 0x15d   : > { %2354 = vmatpush1.bf16.msra.mxu1 %v3705_v14 }
 0x15e   : > { %2082 = vmatpush1.bf16.msra.mxu0 %v3579_v18  ;;  %v3701_v18 = vld [vmem:[%s4491_s30 + $0x3e4] ss:$8 sps:$4 sm:$0xff]   ;;  %2355 = vmatprep.subr.bf16.mxu1 %v3710_v16 }
 0x15f   : > { %2083 = vmatprep.subr.bf16.mxu0 %v3587_v19  ;;  %v3708_v19 = vld [vmem:[%s4720_s11 + $0x10] ss:$8 sps:$4 sm:$0xff]  }
 0x161   : > { %2356 = vmatpush1.bf16.msra.mxu1 %v3708_v19 }
 0x162   : > { %2084 = vmatpush1.bf16.msra.mxu0 %v3585_v22  ;;  %v3704_v22 = vld [vmem:[%s4491_s30 + $0x3f4] ss:$8 sps:$4 sm:$0xff]   ;;  %2357 = vmatprep.subr.bf16.mxu1 %v3713_v20  ;;  %v3753_v20 = vld [vmem:[%s4763_s15] ss:$8 sps:$4 sm:$0xff]  }
 0x163   : > { %2085 = vmatprep.subr.bf16.mxu0 %v3593_v23  ;;  %v3711_v23 = vld [vmem:[%s4720_s11 + $0x20] ss:$8 sps:$4 sm:$0xff]  }
 0x165   : > { %2358 = vmatpush1.bf16.msra.mxu1 %v3711_v23  ;;  %v3761_v23 = vld [vmem:[%s4763_s15 + $0x24] ss:$8 sps:$4 sm:$0xff]  }
 0x166   : > { %2086 = vmatpush1.bf16.msra.mxu0 %v3591_v25  ;;  %v3702_v25 = vld [vmem:[%s4491_s30 + $0x3f0] ss:$8 sps:$4 sm:$0xff]   ;;  %2359 = vmatprep.subr.bf16.mxu1 %v3716_v24  ;;  %v3759_v24 = vld [vmem:[%s4763_s15 + $0x20] ss:$8 sps:$4 sm:$0xff]   ;;  %s2698_s30 = sshll.u32 %s592_s12, 4  ;;  %s4832_s30 = int_to_ptr.vmem [resolvable:$true] %s2698_s30 }
 0x167   : > { %2087 = vmatprep.subr.bf16.mxu0 %v3599_v26  ;;  %v3714_v26 = vld [vmem:[%s4720_s11 + $0x30] ss:$8 sps:$4 sm:$0xff]   ;;  %s3977_s14 = scalar_lea.vmem %s4832_s30, 256  ;;  %p3984_p13 = scmp.lt.s32.totalorder %s4832_s30, %s3982_s9 }
 0x168   : > { %p3978_p0 = scmp.ne.s32.totalorder %s4832_s30, %s3977_s14 }
 0x169   : > { %2360 = vmatpush1.bf16.msra.mxu1 %v3714_v26  ;;  %v3762_v26 = vld [vmem:[%s4763_s15 + $0x30] ss:$8 sps:$4 sm:$0xff]  }
 0x16a   : > { %2088 = vmatpush1.bf16.msra.mxu0 %v3597_v28  ;;  %v3067_v28 = vcombine.low %v4683_v48, %v4685_v49  ;;  %2361 = vmatprep.subr.bf16.mxu1 %v3719_v27  ;;  %v3749_v48 = vld [vmem:[%s4720_s11 + $0xe4] ss:$8 sps:$4 sm:$0xff]   ;;  %v3747_v49 = vld [vmem:[%s4720_s11 + $0xe0] ss:$8 sps:$4 sm:$0xff]   ;;  %p3979_p4 = pnand %p3978_p0, %p5032_p5 }
 0x16b   : > { %2089 = vmatprep.subr.bf16.mxu0 %v3605_v29  ;;  %v3717_v29 = vld [vmem:[%s4720_s11 + $0x40] ss:$8 sps:$4 sm:$0xff]   ;;  %v3767_v27 = vld [vmem:[%s4763_s15 + $0x44] ss:$8 sps:$4 sm:$0xff]  }
 0x16c   : > { %p3980_p3 = pneg %p3979_p4 }
 0x16d   : > { %2362 = vmatpush1.bf16.msra.mxu1 %v3717_v29  ;;  %v3770_v29 = vld [vmem:[%s4763_s15 + $0x54] ss:$8 sps:$4 sm:$0xff]  }
 0x16e   : > { %2090 = vmatpush1.bf16.msra.mxu0 %v3603_v30  ;;  %v3722_v30 = vld [vmem:[%s4720_s11 + $0x54] ss:$8 sps:$4 sm:$0xff]  }
 0x16f   : > { %2091 = vmatprep.subr.bf16.mxu0 %v3611_v31  ;;  %v3720_v31 = vld [vmem:[%s4720_s11 + $0x50] ss:$8 sps:$4 sm:$0xff]   ;;  %2363 = vmatprep.subr.bf16.mxu1 %v3722_v30 }
 0x170   : > { %v3768_v30 = vld [vmem:[%s4763_s15 + $0x50] ss:$8 sps:$4 sm:$0xff]  }
 0x171   : > { %2364 = vmatpush1.bf16.msra.mxu1 %v3720_v31  ;;  %v3773_v31 = vld [vmem:[%s4763_s15 + $0x64] ss:$8 sps:$4 sm:$0xff]  }
 0x172   : > { %2092 = vmatpush1.bf16.msra.mxu0 %v3609_v32  ;;  %v3725_v32 = vld [vmem:[%s4720_s11 + $0x64] ss:$8 sps:$4 sm:$0xff]  }
 0x173   : > { %2093 = vmatprep.subr.bf16.mxu0 %v3617_v33  ;;  %v3723_v33 = vld [vmem:[%s4720_s11 + $0x60] ss:$8 sps:$4 sm:$0xff]   ;;  %2365 = vmatprep.subr.bf16.mxu1 %v3725_v32 }
 0x174   : > { %v3771_v32 = vld [vmem:[%s4763_s15 + $0x60] ss:$8 sps:$4 sm:$0xff]  }
 0x175   : > { %2366 = vmatpush1.bf16.msra.mxu1 %v3723_v33  ;;  %v3776_v33 = vld [vmem:[%s4763_s15 + $0x74] ss:$8 sps:$4 sm:$0xff]  }
 0x176   : > { %2094 = vmatpush1.bf16.msra.mxu0 %v3615_v34  ;;  %v3728_v34 = vld [vmem:[%s4720_s11 + $0x74] ss:$8 sps:$4 sm:$0xff]  }
 0x177   : > { %2095 = vmatprep.subr.bf16.mxu0 %v3623_v35  ;;  %v3726_v35 = vld [vmem:[%s4720_s11 + $0x70] ss:$8 sps:$4 sm:$0xff]   ;;  %2367 = vmatprep.subr.bf16.mxu1 %v3728_v34 }
 0x178   : > { %v3774_v34 = vld [vmem:[%s4763_s15 + $0x70] ss:$8 sps:$4 sm:$0xff]  }
 0x179   : > { %2368 = vmatpush1.bf16.msra.mxu1 %v3726_v35  ;;  %v3779_v35 = vld [vmem:[%s4763_s15 + $0x84] ss:$8 sps:$4 sm:$0xff]  }
 0x17a   : > { %2096 = vmatpush1.bf16.msra.mxu0 %v3621_v36  ;;  %v3731_v36 = vld [vmem:[%s4720_s11 + $0x84] ss:$8 sps:$4 sm:$0xff]  }
 0x17b   : > { %2097 = vmatprep.subr.bf16.mxu0 %v3629_v37  ;;  %v3729_v37 = vld [vmem:[%s4720_s11 + $0x80] ss:$8 sps:$4 sm:$0xff]   ;;  %2369 = vmatprep.subr.bf16.mxu1 %v3731_v36 }
 0x17c   : > { %v3777_v36 = vld [vmem:[%s4763_s15 + $0x80] ss:$8 sps:$4 sm:$0xff]  }
 0x17d   : > { %2370 = vmatpush1.bf16.msra.mxu1 %v3729_v37  ;;  %v3782_v37 = vld [vmem:[%s4763_s15 + $0x94] ss:$8 sps:$4 sm:$0xff]  }
 0x17e   : > { %2098 = vmatpush1.bf16.msra.mxu0 %v3627_v38  ;;  %v3734_v38 = vld [vmem:[%s4720_s11 + $0x94] ss:$8 sps:$4 sm:$0xff]  }
 0x17f   : > { %2099 = vmatprep.subr.bf16.mxu0 %v3635_v39  ;;  %v3732_v39 = vld [vmem:[%s4720_s11 + $0x90] ss:$8 sps:$4 sm:$0xff]   ;;  %2371 = vmatprep.subr.bf16.mxu1 %v3734_v38 }
 0x180   : > { %v3780_v38 = vld [vmem:[%s4763_s15 + $0x90] ss:$8 sps:$4 sm:$0xff]  }
 0x181   : > { %2372 = vmatpush1.bf16.msra.mxu1 %v3732_v39  ;;  %v3785_v39 = vld [vmem:[%s4763_s15 + $0xa4] ss:$8 sps:$4 sm:$0xff]  }
 0x182   : > { %2100 = vmatpush1.bf16.msra.mxu0 %v3633_v40  ;;  %v3737_v40 = vld [vmem:[%s4720_s11 + $0xa4] ss:$8 sps:$4 sm:$0xff]  }
 0x183   : > { %2101 = vmatprep.subr.bf16.mxu0 %v3641_v41  ;;  %v3735_v41 = vld [vmem:[%s4720_s11 + $0xa0] ss:$8 sps:$4 sm:$0xff]   ;;  %2373 = vmatprep.subr.bf16.mxu1 %v3737_v40 }
 0x184   : > { %v3783_v40 = vld [vmem:[%s4763_s15 + $0xa0] ss:$8 sps:$4 sm:$0xff]  }
 0x185   : > { %2374 = vmatpush1.bf16.msra.mxu1 %v3735_v41  ;;  %v3788_v41 = vld [vmem:[%s4763_s15 + $0xb4] ss:$8 sps:$4 sm:$0xff]  }
 0x186   : > { %2102 = vmatpush1.bf16.msra.mxu0 %v3639_v42  ;;  %v3740_v42 = vld [vmem:[%s4720_s11 + $0xb4] ss:$8 sps:$4 sm:$0xff]  }
 0x187   : > { %2103 = vmatprep.subr.bf16.mxu0 %v3647_v43  ;;  %v3738_v43 = vld [vmem:[%s4720_s11 + $0xb0] ss:$8 sps:$4 sm:$0xff]   ;;  %2375 = vmatprep.subr.bf16.mxu1 %v3740_v42 }
 0x188   : > { %v3786_v42 = vld [vmem:[%s4763_s15 + $0xb0] ss:$8 sps:$4 sm:$0xff]  }
 0x189   : > { %2376 = vmatpush1.bf16.msra.mxu1 %v3738_v43  ;;  %v3791_v43 = vld [vmem:[%s4763_s15 + $0xc4] ss:$8 sps:$4 sm:$0xff]  }
 0x18a   : > { %2104 = vmatpush1.bf16.msra.mxu0 %v3645_v44  ;;  %v3743_v44 = vld [vmem:[%s4720_s11 + $0xc4] ss:$8 sps:$4 sm:$0xff]  }
 0x18b   : > { %2105 = vmatprep.subr.bf16.mxu0 %v3653_v45  ;;  %v3741_v45 = vld [vmem:[%s4720_s11 + $0xc0] ss:$8 sps:$4 sm:$0xff]   ;;  %2377 = vmatprep.subr.bf16.mxu1 %v3743_v44 }
 0x18c   : > { %v3789_v44 = vld [vmem:[%s4763_s15 + $0xc0] ss:$8 sps:$4 sm:$0xff]  }
 0x18d   : > { %2378 = vmatpush1.bf16.msra.mxu1 %v3741_v45  ;;  %v3794_v45 = vld [vmem:[%s4763_s15 + $0xd4] ss:$8 sps:$4 sm:$0xff]  }
 0x18e   : > { %2106 = vmatpush1.bf16.msra.mxu0 %v3651_v46  ;;  %v3746_v46 = vld [vmem:[%s4720_s11 + $0xd4] ss:$8 sps:$4 sm:$0xff]  }
 0x18f   : > { %2118 = vmatprep.subr.bf16.mxu0 %v3659_v47  ;;  %v3744_v47 = vld [vmem:[%s4720_s11 + $0xd0] ss:$8 sps:$4 sm:$0xff]   ;;  %2379 = vmatprep.subr.bf16.mxu1 %v3746_v46 }
 0x190   : > { %v3792_v46 = vld [vmem:[%s4763_s15 + $0xd0] ss:$8 sps:$4 sm:$0xff]  }
 0x191   : > { %2108 = vmatmul.mubr.bf16.vlgmr.msra.gmra.mrb[0].mxu0 %v3065_v50  ;;  %2380 = vmatpush1.bf16.msra.mxu1 %v3744_v47  ;;  %v3752_v50 = vld [vmem:[%s4720_s11 + $0xf4] ss:$8 sps:$4 sm:$0xff]   ;;  %v3797_v47 = vld [vmem:[%s4763_s15 + $0xe4] ss:$8 sps:$4 sm:$0xff]  }
 0x192   : > { %2119 = vmatpush1.bf16.msra.mxu0 %v3657_v51  ;;  %2150 = vmatprep.mubr.bf16.mxu0 %v3068_v52  ;;  %v3750_v51 = vld [vmem:[%s4720_s11 + $0xf0] ss:$8 sps:$4 sm:$0xff]   ;;  %v3755_v52 = vld [vmem:[%s4763_s15 + $0x4] ss:$8 sps:$4 sm:$0xff]   ;;  %s4838_s11 = scalar_lea.hbm %s4972_s10, %s4830_s28 }
 0x193   : > { %2120 = vmatprep.subr.bf16.mxu0 %v3662_v53  ;;  %2381 = vmatprep.subr.bf16.mxu1 %v3749_v48  ;;  %v3795_v48 = vld [vmem:[%s4763_s15 + $0xe0] ss:$8 sps:$4 sm:$0xff]  }
 0x195   : > { %2382 = vmatpush1.bf16.msra.mxu1 %v3747_v49  ;;  %v3800_v49 = vld [vmem:[%s4763_s15 + $0xf4] ss:$8 sps:$4 sm:$0xff]  }
 0x196   : > { %2121 = vmatpush1.bf16.msra.mxu0 %v3660_v54  ;;  %2383 = vmatprep.subr.bf16.mxu1 %v3752_v50  ;;  %v3798_v50 = vld [vmem:[%s4763_s15 + $0xf0] ss:$8 sps:$4 sm:$0xff]  }
 0x197   : > { %2122 = vmatprep.subr.bf16.mxu0 %v3665_v55 }
 0x199   : > { %2384 = vmatpush1.bf16.msra.mxu1 %v3750_v51  ;;  %v849_v51 = vld [vmem:[%s607_s27] sm:$0x3] }
 0x19a   : > { %2123 = vmatpush1.bf16.msra.mxu0 %v3663_v56  ;;  %2573 = vmatprep.subr.bf16.mxu1 %v3755_v52 }
 0x19b   : > { %2124 = vmatprep.subr.bf16.mxu0 %v3668_v57  ;;  %v2162_v57 = vlaneseq }
 0x19e   : > { %2125 = vmatpush1.bf16.msra.mxu0 %v3666_v58  ;;  %v2163_v58 = vshrl.u32 %v2162_v57, 7 }
 0x19f   : > { %2126 = vmatprep.subr.bf16.mxu0 %v3671_v59 }
 0x1a0   : > { %v4774_v59 = vsub.s32 0, %v2163_v58 }
 0x1a2   : > { %2127 = vmatpush1.bf16.msra.mxu0 %v3669_v60  ;;  %v816_v60 = vld [vmem:[%s603_s8] sm:$0x3]  ;;  %v2186_v52 = vrot.slane %v849_v51, %v4774_v59  ;;  %s3983_s8 = scalar_lea.vmem %s3982_s9, 512 }
 0x1a3   : > { %2128 = vmatprep.subr.bf16.mxu0 %v3674_v61  ;;  %v4776_v61 = vsub.s32 1, %v2163_v58  ;;  %p3985_p7 = scmp.lt.s32.totalorder %s3983_s8, %s3977_s14 }
 0x1a5   : > { %p3986_p11 = por %p3985_p7, %p3984_p13 }
 0x1a6   : > { %2129 = vmatpush1.bf16.msra.mxu0 %v3672_v62  ;;  %v2165_v62 = vrot.slane %v816_v60, %v4774_v59 }
 0x1a7   : > { %2130 = vmatprep.subr.bf16.mxu0 %v3677_v63  ;;  %p3987_p6 = pnand %p3986_p11, %p3980_p3 }
 0x1aa   : > { %2131 = vmatpush1.bf16.msra.mxu0 %v3675_v0  ;;  %v2169_v0 = vrot.slane %v816_v60, %v4776_v61 }
 0x1ab   : > { %2132 = vmatprep.subr.bf16.mxu0 %v3680_v1 }
 0x1ae   : > { %2133 = vmatpush1.bf16.msra.mxu0 %v3678_v4 }
 0x1af   : > { %2134 = vmatprep.subr.bf16.mxu0 %v3683_v5 }
 0x1b2   : > { %2135 = vmatpush1.bf16.msra.mxu0 %v3681_v6 }
 0x1b3   : > { %2136 = vmatprep.subr.bf16.mxu0 %v3686_v7 }
 0x1b6   : > { %2137 = vmatpush1.bf16.msra.mxu0 %v3684_v8 }
 0x1b7   : > { %2138 = vmatprep.subr.bf16.mxu0 %v3689_v9 }
 0x1ba   : > { %2139 = vmatpush1.bf16.msra.mxu0 %v3687_v10 }
 0x1bb   : > { %2140 = vmatprep.subr.bf16.mxu0 %v3692_v2 }
 0x1be   : > { %2141 = vmatpush1.bf16.msra.mxu0 %v3690_v3 }
 0x1bf   : > { %2142 = vmatprep.subr.bf16.mxu0 %v3695_v11 }
 0x1c2   : > { %2143 = vmatpush1.bf16.msra.mxu0 %v3693_v12 }
 0x1c3   : > { %2144 = vmatprep.subr.bf16.mxu0 %v3698_v13 }
 0x1c6   : > { %2145 = vmatpush1.bf16.msra.mxu0 %v3696_v17 }
 0x1c7   : > { %2146 = vmatprep.subr.bf16.mxu0 %v3701_v18 }
 0x1ca   : > { %2147 = vmatpush1.bf16.msra.mxu0 %v3699_v21  ;;  %v3758_v21 = vld [vmem:[%s4763_s15 + $0x14] ss:$8 sps:$4 sm:$0xff]  }
 0x1cb   : > { %2148 = vmatprep.subr.bf16.mxu0 %v3704_v22  ;;  %v3756_v22 = vld [vmem:[%s4763_s15 + $0x10] ss:$8 sps:$4 sm:$0xff]  }
 0x1ce   : > { %2149 = vmatpush1.bf16.msra.mxu0 %v3702_v25  ;;  %v3764_v25 = vld [vmem:[%s4763_s15 + $0x34] ss:$8 sps:$4 sm:$0xff]  }
 0x1d1   : > { %2151 = vmatmul.mubr.bf16.vlgmr.msra.gmra.mrb[0].mxu0 %v3067_v28  ;;  %v3765_v28 = vld [vmem:[%s4763_s15 + $0x40] ss:$8 sps:$4 sm:$0xff]   ;;  %s4842_s15 = scalar_lea.sflag [#allocation13], %s493_s0 }
 0x22a   : > { %v1300_v53 = vpop.f32.mrb[0].mxu1 }
 0x22b   : > { %v1302_v54 = vpop.f32.mrb[1].mxu1 }
 0x22c   : > { %v1304_v55 = vpop.f32.mrb[2].mxu1 }
 0x22d   : > { %v1306_v56 = vpop.f32.mrb[3].mxu1 }
 0x2a4   : > { %v2152_v63 = vpop.f32.mrb[0].mxu0 }
 0x2a5   : > { %v3291_v1 = vadd.f32 %v2152_v63, %v1300_v53  ;;  %v2154_v4 = vpop.f32.mrb[1].mxu0  ;;  %v2190_v53 = vrot.slane %v849_v51, %v4776_v61 }
 0x2a6   : > { %v3292_v5 = vadd.f32 %v2154_v4, %v1302_v54  ;;  %v2156_v6 = vpop.f32.mrb[2].mxu0 }
 0x2a7   : > { %v2172_v7 = vadd.f32 %v3291_v1, %v2165_v62  ;;  %v3293_v8 = vadd.f32 %v2156_v6, %v1304_v55  ;;  %v2158_v9 = vpop.f32.mrb[3].mxu0 }
 0x2a8   : > { %v2173_v10 = vadd.f32 %v3292_v5, %v2169_v0  ;;  %v3294_v2 = vadd.f32 %v2158_v9, %v1306_v56 }
 0x2a9   : > { %v2176_v3 = vmax.f32 %v2172_v7, 0.0  ;;  %v2174_v11 = vadd.f32 %v3293_v8, %v2165_v62 }
 0x2aa   : > { %v2177_v12 = vmax.f32 %v2173_v10, 0.0  ;;  %v2175_v13 = vadd.f32 %v3294_v2, %v2169_v0 }
 0x2ab   : > { %v2178_v14 = vmax.f32 %v2174_v11, 0.0 }
 0x2ac   : > { %v3282_v15 = vpack.c.bf16 %v2177_v12, %v2176_v3  ;;  %v2179_v16 = vmax.f32 %v2175_v13, 0.0 }
 0x2ad   : > { %v2180_v17 = vpack.c.bf16 %v2178_v14, %v2176_v3 }
 0x2ae   : > { %2632 = vst [vmem:[%s4784_s22] sm:$0xff] %v3282_v15  ;;  %v3283_v18 = vpack.c.bf16 %v2179_v16, %v2178_v14  ;;  %v2181_v19 = vpack.c.bf16 %v2179_v16, %v2177_v12 }
 0x2b0   : > { %2633 = vst [vmem:[%s4784_s22 + $0x8] sm:$0xff] %v3283_v18  ;;  %2385 = vmatprep.mubr.bf16.mxu1 %v2181_v19 }
 0x2b1   : > { %2386 = vmatmul.mubr.bf16.vlgmr.msra.gmra.mrb[4].mxu1 %v2180_v17 }
 0x2b2   : > { %2574 = vmatpush1.bf16.msra.mxu1 %v3753_v20 }
 0x2b3   : > { %2575 = vmatprep.subr.bf16.mxu1 %v3758_v21 }
 0x2b6   : > { %2576 = vmatpush1.bf16.msra.mxu1 %v3756_v22 }
 0x2b7   : > { %2577 = vmatprep.subr.bf16.mxu1 %v3761_v23 }
 0x2ba   : > { %2578 = vmatpush1.bf16.msra.mxu1 %v3759_v24 }
 0x2bb   : > { %2579 = vmatprep.subr.bf16.mxu1 %v3764_v25 }
 0x2be   : > { %2580 = vmatpush1.bf16.msra.mxu1 %v3762_v26 }
 0x2bf   : > { %2581 = vmatprep.subr.bf16.mxu1 %v3767_v27 }
 0x2c2   : > { %2582 = vmatpush1.bf16.msra.mxu1 %v3765_v28 }
 0x2c3   : > { %2583 = vmatprep.subr.bf16.mxu1 %v3770_v29 }
 0x2c6   : > { %2584 = vmatpush1.bf16.msra.mxu1 %v3768_v30 }
 0x2c7   : > { %2585 = vmatprep.subr.bf16.mxu1 %v3773_v31 }
 0x2ca   : > { %2586 = vmatpush1.bf16.msra.mxu1 %v3771_v32 }
 0x2cb   : > { %2587 = vmatprep.subr.bf16.mxu1 %v3776_v33 }
 0x2ce   : > { %2588 = vmatpush1.bf16.msra.mxu1 %v3774_v34 }
 0x2cf   : > { %2589 = vmatprep.subr.bf16.mxu1 %v3779_v35 }
 0x2d2   : > { %2590 = vmatpush1.bf16.msra.mxu1 %v3777_v36 }
 0x2d3   : > { %2591 = vmatprep.subr.bf16.mxu1 %v3782_v37 }
 0x2d6   : > { %2592 = vmatpush1.bf16.msra.mxu1 %v3780_v38 }
 0x2d7   : > { %2593 = vmatprep.subr.bf16.mxu1 %v3785_v39 }
 0x2da   : > { %2594 = vmatpush1.bf16.msra.mxu1 %v3783_v40 }
 0x2db   : > { %2595 = vmatprep.subr.bf16.mxu1 %v3788_v41 }
 0x2de   : > { %2596 = vmatpush1.bf16.msra.mxu1 %v3786_v42 }
 0x2df   : > { %2597 = vmatprep.subr.bf16.mxu1 %v3791_v43 }
 0x2e2   : > { %2598 = vmatpush1.bf16.msra.mxu1 %v3789_v44 }
 0x2e3   : > { %2599 = vmatprep.subr.bf16.mxu1 %v3794_v45 }
 0x2e6   : > { %2600 = vmatpush1.bf16.msra.mxu1 %v3792_v46 }
 0x2e7   : > { %2601 = vmatprep.subr.bf16.mxu1 %v3797_v47 }
 0x2ea   : > { %2602 = vmatpush1.bf16.msra.mxu1 %v3795_v48 }
 0x2eb   : > { %2603 = vmatprep.subr.bf16.mxu1 %v3800_v49 }
 0x2ee   : > { %2604 = vmatpush1.bf16.msra.mxu1 %v3798_v50 }
 0x384   : > { %v2387_v54 = vpop.f32.mrb[4].mxu1 }
 0x385   : > { %v2388_v55 = vadd.f32 %v2387_v54, %v2186_v52  ;;  %v2389_v56 = vpop.f32.mrb[5].mxu1 }
 0x386   : > { %v2390_v57 = vadd.f32 %v2389_v56, %v2190_v53  ;;  %v2391_v58 = vpop.f32.mrb[6].mxu1 }
 0x387   : > { %v2396_v60 = vmax.f32 %v2388_v55, 0.0  ;;  %v2392_v62 = vadd.f32 %v2391_v58, %v2186_v52  ;;  %v2393_v63 = vpop.f32.mrb[7].mxu1 }
 0x388   : > { %v2397_v0 = vmax.f32 %v2390_v57, 0.0  ;;  %v2394_v1 = vadd.f32 %v2393_v63, %v2190_v53 }
 0x389   : > { %v2398_v4 = vmax.f32 %v2392_v62, 0.0 }
 0x38a   : > { %v3284_v5 = vpack.c.bf16 %v2397_v0, %v2396_v60  ;;  %v2399_v6 = vmax.f32 %v2394_v1, 0.0 }
 0x38b   : > { %v2400_v7 = vpack.c.bf16 %v2398_v4, %v2396_v60 }
 0x38c   : > { %2644 = vst [vmem:[%s592_s12] sm:$0xff] %v3284_v5  ;;  %v2401_v8 = vpack.c.bf16 %v2399_v6, %v2397_v0  ;;  %v3285_v9 = vpack.c.bf16 %v2399_v6, %v2398_v4 }
 0x38e   : > { %2645 = vst [vmem:[%s592_s12 + $0x8] sm:$0xff] %v3285_v9  ;;  %2605 = vmatprep.mubr.bf16.mxu1 %v2401_v8 }
 0x38f   : > { %2606 = vmatmul.mubr.bf16.vlgmr.msra.gmra.mrb[8].mxu1 %v2400_v7 }
 0x390   : > { %3990 = shalt.err (!%p3987_p6)
}
 0x391   : > { %s3991_s21 = scalar_lea.hbm %s4838_s11, 256  ;;  %s3995_s2 = scalar_lea.hbm %s4972_s10, 512 }
 0x392   : > { %p3992_p2 = scmp.ne.s32.totalorder %s4838_s11, %s3991_s21  ;;  %p3996_p10 = scmp.lt.u32.totalorder %s4838_s11, %s4972_s10 }
 0x393   : > { %p3997_p12 = scmp.lt.u32.totalorder %s3995_s2, %s3991_s21  ;;  %p3999_p0 = scmp.lt.u32.totalorder %s3991_s21, %s4838_s11 }
 0x394   : > { %p3993_p8 = pnand %p3992_p2, %p5032_p5 }
 0x395   : > { %p3998_p1 = por %p3997_p12, %p3996_p10 }
 0x396   : > { %p3994_p9 = pneg %p3993_p8 }
 0x397   : > { %p4000_p4 = por %p3999_p0, %p3998_p1 }
 0x399   : > { %p4001_p3 = pnand %p4000_p4, %p3994_p9 }
 0x39b   : > { %4004 = shalt.err (!%p4001_p3)
}
 0x39c   : > { %s4126_s12 = smov 128   ;;  %s4127_s25 = smov 8  }
 0x39d   : > { %3328 = dma.vmem_to_hbm [thread:$0]  (%p5032_p5), %s4832_s30, 256, %s4838_s11, %s4842_s15, %s4126_s12, %s4126_s12, %s4127_s25  }
 0x39e   : > { %s5033_s19 = sld [smem:[#allocation28_spill]]  ;;  %s2659_s21 = scalar_lea.sflag [#allocation4], %s4486_s16 }
 0x39f   : > { %s4005_s0 = scalar_lea.vmem %s4827_s26, 256  ;;  %s4128_s22 = smov [#allocation11]  }
 0x3a0   : > { %p4006_p13 = scmp.ne.s32.totalorder %s4827_s26, %s4005_s0  ;;  %s4009_s2 = sshll.u32 %s4128_s22, 4  ;;  %s4010_s2 = int_to_ptr.vmem [resolvable:$false] %s4009_s2 }
 0x3a1   : > { %s4011_s23 = scalar_lea.vmem %s4010_s2, 512  ;;  %p4012_p6 = scmp.lt.s32.totalorder %s4827_s26, %s4010_s2 }
 0x3a2   : > { %p4007_p7 = pnand %p4006_p13, %p5032_p5  ;;  %p4013_p2 = scmp.lt.s32.totalorder %s4011_s23, %s4005_s0 }
 0x3a4   : > { %s5034_s9 = smov %s5033_s19  ;;  %s4873_s8 = scalar_lea.hbm %s5033_s19, %s4830_s28 }
 0x3a5   : > { %p4008_p11 = pneg %p4007_p7  ;;  %p4014_p8 = por %p4013_p2, %p4012_p6 }
 0x3a7   : > { %p4015_p9 = pnand %p4014_p8, %p4008_p11 }
 0x3a9   : > { %4018 = shalt.err (!%p4015_p9)
}
 0x3aa   : > { %s4019_s30 = scalar_lea.hbm %s4873_s8, 256  ;;  %s4023_s17 = scalar_lea.hbm %s5034_s9, 512 }
 0x3ab   : > { %p4020_p10 = scmp.ne.s32.totalorder %s4873_s8, %s4019_s30  ;;  %p4024_p0 = scmp.lt.u32.totalorder %s4873_s8, %s5034_s9 }
 0x3ac   : > { %p4025_p4 = scmp.lt.u32.totalorder %s4023_s17, %s4019_s30  ;;  %p4027_p13 = scmp.lt.u32.totalorder %s4019_s30, %s4873_s8 }
 0x3ad   : > { %p4021_p12 = pnand %p4020_p10, %p5032_p5 }
 0x3ae   : > { %p4026_p3 = por %p4025_p4, %p4024_p0 }
 0x3af   : > { %p4022_p1 = pneg %p4021_p12 }
 0x3b0   : > { %p4028_p7 = por %p4027_p13, %p4026_p3 }
 0x3b2   : > { %p4029_p11 = pnand %p4028_p7, %p4022_p1 }
 0x3b4   : > { %4032 = shalt.err (!%p4029_p11)
}
 0x3b5   : > { %3327 = dma.vmem_to_hbm [thread:$0]  (%p5032_p5), %s4827_s26, 256, %s4873_s8, %s2659_s21, %s4126_s12, %s4126_s12, %s4127_s25  }
 0x3b6   : > { %s5035_s2 = sld [smem:[#allocation27_spill]]  ;;  %s599_s16 = scalar_lea.vmem [#allocation14], %s4781_s24 }
 0x3b7   : > { %s2714_s26 = sshll.u32 %s599_s16, 4  ;;  %s5036_s21 = sld [smem:[#allocation29_spill]]  ;;  %s4909_s26 = int_to_ptr.vmem [resolvable:$true] %s2714_s26 }
 0x3b8   : > { %s4033_s11 = scalar_lea.vmem %s4909_s26, 256  ;;  %s4129_s24 = smov [#allocation14]  }
 0x3b9   : > { %p4034_p6 = scmp.ne.s32.totalorder %s4909_s26, %s4033_s11  ;;  %s4037_s27 = sshll.u32 %s4129_s24, 4  ;;  %s4038_s27 = int_to_ptr.vmem [resolvable:$false] %s4037_s27 }
 0x3ba   : > { %s4039_s17 = scalar_lea.vmem %s4038_s27, 512  ;;  %p4040_p9 = scmp.lt.s32.totalorder %s4909_s26, %s4038_s27 }
 0x3bb   : > { %p4035_p2 = pnand %p4034_p6, %p5032_p5  ;;  %p4041_p10 = scmp.lt.s32.totalorder %s4039_s17, %s4033_s11 }
 0x3bc   : > { %s611_s23 = scalar_lea.vmem %s5035_s2, %s4768_s13 }
 0x3bd   : > { %v882_v10 = vld [vmem:[%s611_s23] sm:$0x3]  ;;  %s4915_s30 = scalar_lea.hbm %s5036_s21, %s4830_s28  ;;  %p4036_p8 = pneg %p4035_p2 }
 0x3be   : > { %v2406_v2 = vrot.slane %v882_v10, %v4774_v59  ;;  %v2410_v3 = vrot.slane %v882_v10, %v4776_v61  ;;  %p4042_p12 = por %p4041_p10, %p4040_p9 }
 0x3c0   : > { %p4043_p1 = pnand %p4042_p12, %p4036_p8 }
 0x462   : > { %v2607_v11 = vpop.f32.mrb[8].mxu1 }
 0x463   : > { %v2608_v12 = vadd.f32 %v2607_v11, %v2406_v2  ;;  %v2609_v13 = vpop.f32.mrb[9].mxu1 }
 0x464   : > { %v2610_v14 = vadd.f32 %v2609_v13, %v2410_v3  ;;  %v2611_v15 = vpop.f32.mrb[10].mxu1 }
 0x465   : > { %v2616_v16 = vmax.f32 %v2608_v12, 0.0  ;;  %v2612_v17 = vadd.f32 %v2611_v15, %v2406_v2  ;;  %v2613_v18 = vpop.f32.mrb[11].mxu1 }
 0x466   : > { %v2617_v19 = vmax.f32 %v2610_v14, 0.0  ;;  %v2614_v20 = vadd.f32 %v2613_v18, %v2410_v3 }
 0x467   : > { %v2618_v21 = vmax.f32 %v2612_v17, 0.0 }
 0x468   : > { %v3286_v22 = vpack.c.bf16 %v2617_v19, %v2616_v16  ;;  %v2619_v23 = vmax.f32 %v2614_v20, 0.0 }
 0x46a   : > { %2656 = vst [vmem:[%s599_s16] sm:$0xff] %v3286_v22  ;;  %v3287_v59 = vpack.c.bf16 %v2619_v23, %v2618_v21 }
 0x46c   : > { %2657 = vst [vmem:[%s599_s16 + $0x8] sm:$0xff] %v3287_v59 }
 0x46d   : > { %4046 = shalt.err (!%p4043_p1)
}
 0x46e   : > { %s4047_s28 = scalar_lea.hbm %s4915_s30, 256  ;;  %s4051_s0 = scalar_lea.hbm %s5036_s21, 512 }
 0x46f   : > { %p4048_p0 = scmp.ne.s32.totalorder %s4915_s30, %s4047_s28  ;;  %p4052_p13 = scmp.lt.u32.totalorder %s4915_s30, %s5036_s21 }
 0x470   : > { %p4053_p7 = scmp.lt.u32.totalorder %s4051_s0, %s4047_s28  ;;  %p4055_p6 = scmp.lt.u32.totalorder %s4047_s28, %s4915_s30 }
 0x471   : > { %p4049_p4 = pnand %p4048_p0, %p5032_p5 }
 0x472   : > { %p4054_p11 = por %p4053_p7, %p4052_p13 }
 0x473   : > { %p4050_p3 = pneg %p4049_p4 }
 0x474   : > { %p4056_p2 = por %p4055_p6, %p4054_p11 }
 0x476   : > { %p4057_p8 = pnand %p4056_p2, %p4050_p3 }
 0x478   : > { %4060 = shalt.err (!%p4057_p8)
}
 0x479   : > { %3329 = dma.vmem_to_hbm [thread:$0]  (%p5032_p5), %s4909_s26, 256, %s4915_s30, %s4842_s15, %s4126_s12, %s4126_s12, %s4127_s25  }
 0x47a PF: > { %s5037_s23 = sld [smem:[#allocation20_spill]]  ;;  %s5038_s16 = sld [smem:[#allocation24_spill]] }
 0x47b   : > { %p5040_p10 = scmp.ge.s32.totalorder %s4111_s20, 2 }
 0x480   : > { %s2729_s13 = sand.u32 1, %s5037_s23   ;;  %p5039_p9 = scmp.ne.s32.totalorder %s5038_s16, 0 }
 0x481   : > { %s2730_s8 = scalar_lea.sflag [#allocation4], %s2729_s13 }
 0x482   : > { %p3354_p12 = pnand %p5040_p10, %p5039_p9 }
 0x484   : > { %4090 = dma.done.wait (!%p3354_p12), %s2730_s8, 256  }
 0x485   : > { %4092 = vsyncadd (!%p3354_p12), %s2730_s8, 4294967040  ;;  %s5041_s29 = sadd.s32 4294967294, %s4111_s20  }
 0x486   : > { %s2738_s11 = sand.u32 1, %s5041_s29  }
 0x487   : > { %s2739_s24 = scalar_lea.sflag [#allocation13], %s2738_s11 }
 0x488   : > { %4094 = dma.done.wait (!%p3354_p12), %s2739_s24, 512  }
 0x489   : > { %4096 = vsyncadd (!%p3354_p12), %s2739_s24, 4294966784  ;;  %s5042_s20 = sld [smem:[#allocation22_spill]]  ;;  %s5043_s15 = sld [smem:[#allocation21_spill]] }
 0x48a   : > { %s5044_s19 = sld [smem:[#allocation23_spill]]  ;;  %s5045_s17 = smov %s4103_s18 }
 0x48f   : > { %p27_p5 = scmp.ge.s32.totalorder %s5042_s20, 4   ;;  %s5046_s18 = smov %s5043_s15 }
 0x491   :  { %29 = sbr.rel (!%p27_p5) target bundleno = 13 (0xd), region = 182 }
 0x498   :  { %2753 = vsyncpa [#allocation3], 1 }
 0x499   :  { %2755 = vsyncpa [#allocation3 + $0x1], 1 }
 0x49a   :  { %2756 = vsyncpa [#allocation6], 1 }
 0x49b   :  { %2757 = vsyncpa [#allocation4], 1 }
 0x49c   :  { %2759 = vsyncpa [#allocation4 + $0x1], 1 }
 0x49d   :  { %2760 = vsyncpa [#allocation13], 1 }
 0x49e   :  { %2762 = vsyncpa [#allocation13 + $0x1], 1 }

</bundles_post_ra>
